<compile_context>
chip_gen: v5e
topology: v5e:2x2
jax: 0.10.0
libtpu: 0.0.40
codegen_flags: <defaults>
</compile_context>

<pallas_src>
import jax
import jax.numpy as jnp
from jax import lax
from jax.experimental import pallas as pl
from jax.experimental.pallas import tpu as pltpu

VOCAB = 64
EMBED = 32
CONTEXT = 4          # 2 words on each side of the target
V_PAD = 128          # lane-dense vocab width (multiple of 128)
MIN_TILE = 128       # one full MXU M pass / sublane-aligned batch tile
MAX_TILE = 512       # ~0.6 MB of VMEM incl. double-buffered output: free
NEG = -1e30          # logit value for padded vocab lanes


def _batch_tiling(b):
    """Pick (B_pad, TB): tiles as large as possible (<=MAX_TILE) while keeping
    >= 2 grid steps when the batch allows it (v7x megacore sharding)."""
    b_pad = -(-b // MIN_TILE) * MIN_TILE
    if b_pad // MIN_TILE >= 2:
        tb = min(MAX_TILE, (b_pad // 2 // MIN_TILE) * MIN_TILE)
    else:
        tb = b_pad
    while b_pad % tb:
        tb -= MIN_TILE
    return b_pad, tb


def cbow_kernel(idx_ref, m_ref, b_ref, out_ref):
    # idx_ref: (TB, CONTEXT) int32   m_ref: (V_PAD, V_PAD) f32  (E @ W^T, padded)
    # b_ref:   (1, V_PAD) f32        out_ref: (TB, V_PAD) f32
    idx = idx_ref[...]                                         # (TB, C)
    tb = idx.shape[0]

    # Summed one-hot "counts": counts[b, v] = #{c : idx[b, c] == v}.
    # CONTEXT is tiny and static -> short unrolled chain of vectorized VPU
    # compares/adds over full (TB, V_PAD) vregs; accumulate in int32 and
    # convert to f32 exactly once.
    col = lax.broadcasted_iota(jnp.int32, (tb, V_PAD), 1)      # (TB, V_PAD)
    counts_i = jnp.zeros((tb, V_PAD), jnp.int32)
    for c in range(CONTEXT):
        counts_i = counts_i + (idx[:, c:c + 1] == col).astype(jnp.int32)
    counts = counts_i.astype(jnp.float32)

    # Fused projection: counts @ (E @ W^T) + b  ==  (sum_c E[idx_c]) @ W^T + b.
    # Single lane-full (TB,128)@(128,128) MXU contraction.
    logits = jnp.dot(counts, m_ref[...],
                     preferred_element_type=jnp.float32) + b_ref[...]

    # Stable log-softmax; padded lanes hold NEG so they contribute ~0 to lse
    # and never win the max.
    m = jnp.max(logits, axis=-1, keepdims=True)
    shifted = logits - m
    lse = jnp.log(jnp.sum(jnp.exp(shifted), axis=-1, keepdims=True))
    out_ref[...] = shifted - lse


def prepare_params(emb_table, w, b):
    """One-time (init) padding + algebraic fusion of the module parameters.

    emb_table: (V, D) f32, w: (V, D) f32 (PyTorch Linear layout), b: (V,) f32.
    Returns (M_pad, b_pad): M_pad = E_pad @ W_pad^T of shape (V_PAD, V_PAD);
    b_pad is (1, V_PAD) with NEG in the padded vocab lanes.
    """
    V, D = emb_table.shape
    emb_p = jnp.zeros((V_PAD, D), jnp.float32).at[:V, :].set(
        emb_table.astype(jnp.float32))
    w_p = jnp.zeros((V_PAD, D), jnp.float32).at[:V, :].set(w.astype(jnp.float32))
    m_p = emb_p @ w_p.T                                         # (V_PAD, V_PAD)
    b_p = jnp.full((1, V_PAD), NEG, jnp.float32).at[0, :V].set(
        b.astype(jnp.float32))
    return m_p, b_p


def cbow_forward_batched(indices, m_p, b_p):
    """indices: (B, CONTEXT) int; m_p/b_p from prepare_params().

    Returns the lane-dense padded log-prob block of shape (B_pad, V_PAD);
    rows >= B and lanes >= VOCAB are padding (slice at the consumer).
    """
    B = indices.shape[0]
    B_pad, TB = _batch_tiling(B)

    idx_p = jnp.zeros((B_pad, CONTEXT), jnp.int32).at[:B, :].set(
        indices.astype(jnp.int32))

    return pl.pallas_call(
        cbow_kernel,
        out_shape=jax.ShapeDtypeStruct((B_pad, V_PAD), jnp.float32),
        grid_spec=pltpu.PrefetchScalarGridSpec(
            num_scalar_prefetch=0,
            grid=(B_pad // TB,),
            in_specs=[
                pl.BlockSpec((TB, CONTEXT), lambda i: (i, 0)),       # batch tile
                pl.BlockSpec((V_PAD, V_PAD), lambda i: (0, 0)),      # resident M
                pl.BlockSpec((1, V_PAD), lambda i: (0, 0)),          # resident b
            ],
            out_specs=pl.BlockSpec((TB, V_PAD), lambda i: (i, 0)),
        ),
        compiler_params=pltpu.CompilerParams(
            dimension_semantics=("parallel",)),                      # v7x: 2 TCs
    )(idx_p, m_p, b_p)


def cbow_forward(indices, m_p, b_p):
    """Single example (the tutorial's forward(inputs)): (CONTEXT,) -> (1, V)."""
    out = cbow_forward_batched(indices.reshape(1, -1), m_p, b_p)
    return out[:1, :VOCAB]


def cbow_reference(indices, emb_table, w, b):
    embeds = jnp.sum(emb_table[indices], axis=-2)                 # (B, D)
    logits = embeds @ w.T + b[None, :]                            # (B, V)
    return jax.nn.log_softmax(logits, axis=-1)


if __name__ == "__main__":
    key = jax.random.PRNGKey(0)
    k_emb, k_w, k_b, k_idx = jax.random.split(key, 4)

    B = 512  # -> B_pad=512, TB=256, grid=2 (both v7x TensorCores get a tile)
    emb_table = jax.random.normal(k_emb, (VOCAB, EMBED), dtype=jnp.float32)
    w = 0.1 * jax.random.normal(k_w, (VOCAB, EMBED), dtype=jnp.float32)
    b = 0.01 * jax.random.normal(k_b, (VOCAB,), dtype=jnp.float32)
    indices = jax.random.randint(k_idx, (B, CONTEXT), 0, VOCAB, dtype=jnp.int32)

    # One-time parameter padding + E@W^T fusion (hoisted out of the call path).
    m_p, b_p = prepare_params(emb_table, w, b)
    m_p, b_p = jax.block_until_ready((m_p, b_p))

    forward = jax.jit(cbow_forward_batched)

    # Batched path: kernel returns the lane-dense padded block; slice only for
    # the correctness check.
    out_pad = jax.block_until_ready(forward(indices, m_p, b_p))
    out = out_pad[:B, :VOCAB]
    ref = cbow_reference(indices, emb_table, w, b)
    assert out_pad.shape[1] == V_PAD and out.shape == (B, VOCAB)
    assert jnp.allclose(out, ref, atol=2e-5, rtol=1e-5), "batched mismatch"

    # Single-example path (matches the PyTorch module's forward(inputs)).
    out1 = jax.block_until_ready(cbow_forward(indices[0], m_p, b_p))
    ref1 = cbow_reference(indices[:1], emb_table, w, b)
    assert out1.shape == (1, VOCAB)
    assert jnp.allclose(out1, ref1, atol=2e-5, rtol=1e-5), "single mismatch"

    print("KERNEL_OK")
</pallas_src>

<mosaic_0001>
module attributes {stable_mosaic.version = 11 : i64} {
  func.func @cbow_kernel(%arg0: i32, %arg1: memref<256x4xi32, #tpu.memory_space<vmem>>, %arg2: memref<128x128xf32, #tpu.memory_space<vmem>>, %arg3: memref<1x128xf32, #tpu.memory_space<vmem>>, %arg4: memref<256x128xf32, #tpu.memory_space<vmem>>) attributes {dimension_semantics = [#tpu.dimension_semantics<parallel>], iteration_bounds = array<i64: 2>, scalar_prefetch = 0 : i64, scratch_operands = 0 : i64, tpu.core_type = #tpu.core_type<tc>, window_params = [{transform_indices = @transform_0, window_bounds = array<i64: 256, 4>}, {pipeline_mode = #tpu.pipeline_mode<synchronous>, transform_indices = @transform_1, window_bounds = array<i64: 128, 128>}, {pipeline_mode = #tpu.pipeline_mode<synchronous>, transform_indices = @transform_2, window_bounds = array<i64: 1, 128>}, {transform_indices = @transform_3, window_bounds = array<i64: 256, 128>}]} {
    %c0 = arith.constant 0 : index
    %c0_0 = arith.constant 0 : index
    %0 = vector.load %arg1[%c0, %c0_0] : memref<256x4xi32, #tpu.memory_space<vmem>>, vector<256x4xi32>
    %1 = tpu.iota {dimensions = array<i32: 1>} : vector<256x128xi32>
    %c0_i32 = arith.constant 0 : i32
    %2 = vector.broadcast %c0_i32 : i32 to vector<256x128xi32>
    %3 = vector.extract_strided_slice %0 {offsets = [0, 0], sizes = [256, 1], strides = [1, 1]} : vector<256x4xi32> to vector<256x1xi32>
    %4 = vector.broadcast %3 : vector<256x1xi32> to vector<256x128xi32>
    %5 = arith.cmpi eq, %4, %1 : vector<256x128xi32>
    %6 = arith.extui %5 : vector<256x128xi1> to vector<256x128xi32>
    %7 = arith.addi %2, %6 : vector<256x128xi32>
    %8 = vector.extract_strided_slice %0 {offsets = [0, 1], sizes = [256, 1], strides = [1, 1]} : vector<256x4xi32> to vector<256x1xi32>
    %9 = vector.broadcast %8 : vector<256x1xi32> to vector<256x128xi32>
    %10 = arith.cmpi eq, %9, %1 : vector<256x128xi32>
    %11 = arith.extui %10 : vector<256x128xi1> to vector<256x128xi32>
    %12 = arith.addi %7, %11 : vector<256x128xi32>
    %13 = vector.extract_strided_slice %0 {offsets = [0, 2], sizes = [256, 1], strides = [1, 1]} : vector<256x4xi32> to vector<256x1xi32>
    %14 = vector.broadcast %13 : vector<256x1xi32> to vector<256x128xi32>
    %15 = arith.cmpi eq, %14, %1 : vector<256x128xi32>
    %16 = arith.extui %15 : vector<256x128xi1> to vector<256x128xi32>
    %17 = arith.addi %12, %16 : vector<256x128xi32>
    %18 = vector.extract_strided_slice %0 {offsets = [0, 3], sizes = [256, 1], strides = [1, 1]} : vector<256x4xi32> to vector<256x1xi32>
    %19 = vector.broadcast %18 : vector<256x1xi32> to vector<256x128xi32>
    %20 = arith.cmpi eq, %19, %1 : vector<256x128xi32>
    %21 = arith.extui %20 : vector<256x128xi1> to vector<256x128xi32>
    %22 = arith.addi %17, %21 : vector<256x128xi32>
    %23 = arith.sitofp %22 : vector<256x128xi32> to vector<256x128xf32>
    %c0_1 = arith.constant 0 : index
    %c0_2 = arith.constant 0 : index
    %24 = vector.load %arg2[%c0_1, %c0_2] : memref<128x128xf32, #tpu.memory_space<vmem>>, vector<128x128xf32>
    %cst = arith.constant dense<0.000000e+00> : vector<256x128xf32>
    %25 = tpu.matmul %23, %24, %cst {dimension_numbers = #tpu.dot_dimension_numbers<[1], [0], [0], [1], [0, 0, 1, 1], [], []>} : vector<256x128xf32>, vector<128x128xf32>, vector<256x128xf32> -> vector<256x128xf32>
    %c0_3 = arith.constant 0 : index
    %c0_4 = arith.constant 0 : index
    %26 = vector.load %arg3[%c0_3, %c0_4] : memref<1x128xf32, #tpu.memory_space<vmem>>, vector<1x128xf32>
    %27 = vector.broadcast %26 : vector<1x128xf32> to vector<256x128xf32>
    %28 = arith.addf %25, %27 : vector<256x128xf32>
    %cst_5 = arith.constant dense<0xFF800000> : vector<256xf32>
    %29 = vector.multi_reduction <maximumf>, %28, %cst_5 [1] : vector<256x128xf32> to vector<256xf32>
    %30 = vector.shape_cast %29 : vector<256xf32> to vector<256x1xf32>
    %31 = vector.broadcast %30 : vector<256x1xf32> to vector<256x128xf32>
    %32 = arith.subf %28, %31 : vector<256x128xf32>
    %33 = math.exp %32 : vector<256x128xf32>
    %cst_6 = arith.constant dense<0.000000e+00> : vector<256xf32>
    %34 = vector.multi_reduction <add>, %33, %cst_6 [1] : vector<256x128xf32> to vector<256xf32>
    %35 = vector.shape_cast %34 : vector<256xf32> to vector<256x1xf32>
    %36 = math.log %35 : vector<256x1xf32>
    %37 = vector.broadcast %36 : vector<256x1xf32> to vector<256x128xf32>
    %38 = arith.subf %32, %37 : vector<256x128xf32>
    %c0_7 = arith.constant 0 : index
    %c0_8 = arith.constant 0 : index
    %39 = vector.load %arg4[%c0_7, %c0_8] : memref<256x128xf32, #tpu.memory_space<vmem>>, vector<256x128xf32>
    tpu.vector_store %arg4[%c0_7, %c0_8], %38 {strides = array<i32>} : memref<256x128xf32, #tpu.memory_space<vmem>>, vector<256x128xf32>,
    return
  }
  func.func @transform_0(%arg0: i32) -> (i32, i32) {
    %c0_i32 = arith.constant 0 : i32
    %c0_i32_0 = arith.constant 0 : i32
    return %arg0, %c0_i32 : i32, i32
  }
  func.func @transform_1(%arg0: i32) -> (i32, i32) {
    %c0_i32 = arith.constant 0 : i32
    %c0_i32_0 = arith.constant 0 : i32
    %c0_i32_1 = arith.constant 0 : i32
    return %c0_i32, %c0_i32_0 : i32, i32
  }
  func.func @transform_2(%arg0: i32) -> (i32, i32) {
    %c0_i32 = arith.constant 0 : i32
    %c0_i32_0 = arith.constant 0 : i32
    %c0_i32_1 = arith.constant 0 : i32
    return %c0_i32, %c0_i32_0 : i32, i32
  }
  func.func @transform_3(%arg0: i32) -> (i32, i32) {
    %c0_i32 = arith.constant 0 : i32
    %c0_i32_0 = arith.constant 0 : i32
    return %arg0, %c0_i32 : i32, i32
  }
}

</mosaic_0001>

<bundles_post_ra>
// kernel: cbow_forward_batched.1
= control target key start
LH: loop header
LB: loop body
LE: loop exit
PB: predicated region body
PF: predicated region fallthrough
CT: control target
= control target key end

     0   :  { %8 = vsyncpa [#allocation3], 0  ;;  %s3143_s0 = inlined_call_operand.vmem [shape: s32[512,4], index: 0, kind: input, shape index: {}]   ;;  %s3144_s1 = inlined_call_operand.vmem [shape: f32[128,128], index: 1, kind: input, shape index: {}]   ;;  %s3145_s2 = inlined_call_operand.vmem [shape: f32[1,128], index: 2, kind: input, shape index: {}]   ;;  %s3146_s3 = inlined_call_operand.hbm [shape: f32[512,128], index: 3, kind: output, shape index: {}]  }
   0x1   :  { %10 = vsyncpa [#allocation3 + $0x1], 0  ;;  %s1874_s12 = smov 0   ;;  %s1876_s13 = smov 0  }
   0x2   :  { %s1878_s14 = smov 0   ;;  %s1880_s15 = smov 0  }
   0x3 LB: > { %s1895_s16 = sadd.s32 4294967295, %s1846_s15   ;;  %s1537_s17 = sadd.s32 4294967294, %s1846_s15   ;;  %s1846_s15 = sphi %s1880_s15, %s3227_s15   ;;  %s1842_s14 = sphi %s1878_s14, %s3226_s14   ;;  %s1838_s13 = sphi %s1876_s13, %s3225_s13   ;;  %s1834_s12 = sphi %s1874_s12, %s3224_s12  }
   0x4   : > { %s1899_s18 = sadd.s32 1, %s1846_s15   ;;  %s91_s19 = sadd.s32 1, %s1842_s14 }
   0x5   : > { %s88_s20 = ssub.s32 %s1846_s15, %s1899_s18  ;;  %p101_p0 = scmp.ne.s32.totalorder %s1842_s14, %s1838_s13 }
   0x6   : > { %p89_p1 = scmp.eq.s32.totalorder %s88_s20, 0  ;;  %p102_p2 = scmp.eq.s32.totalorder %s1895_s16, 1 }
   0x7   : > { %p107_p3 = scmp.ne.s32.totalorder %s1838_s13, %s1834_s12  ;;  %p108_p4 = scmp.eq.s32.totalorder %s1537_s17, 1 }
   0x8   : > { %s1910_s21 = scalar_select %p89_p1, %s1842_s14, %s91_s19  }
   0x9   : > { %p1912_p5 = por %p102_p2, %p101_p0  ;;  %p1916_p6 = por %p108_p4, %p107_p3 }
   0xa   : > { %p1540_p7 = scmp.ge.s32.totalorder %s1846_s15, 1  ;;  %p141_p8 = scmp.lt.s32.totalorder %s1846_s15, 3 }
   0xc   : > { %p142_p9 = pnand %p1540_p7, %p141_p8 }
   0xe   : > { %145 = sbr.rel (%p142_p9) target bundleno = 922 (0x39a), region = 32 }
  0x13   : > { %s1542_s24 = sshll.u32 %s1895_s16, 5  ;;  %v3147_v0 = vmov 0   ;;  %v1849_v33 = vmov 1   ;;  %v1850_v58 = vmov 2   ;;  %s162_s27 = sand.u32 1, %s1838_s13  }
  0x14   : > { %1645 = vset.pattern.permute.xlu2 %v3147_v0  ;;  %1644 = vset.pattern.permute.xlu1 %v3147_v0  ;;  %p166_p10 = scmp.lt.s32.totalorder %s1542_s24, 63  ;;  %s1549_s30 = sshll.u32 %s1895_s16, 8 }
  0x15   : > { %1643 = vset.pattern.permute.xlu0 %v3147_v0  ;;  %s1471_s6 = scalar_lea.hbm %s3146_s3, %s1549_s30  ;;  %s1460_s8 = scalar_lea.sflag [#allocation3], %s162_s27 }
  0x16   : > { %s3229_s24 = smov (!%p166_p10, %s1542_s24), 63  ;;  %s1474_s7 = sshll.u32 %s1471_s6, 4  ;;  %s1475_s7 = int_to_ptr.hbm [resolvable:$true] %s1474_s7 }
  0x17   : > { %s1543_s25 = sshll.u32 %s3229_s24, 3  ;;  %s1798_s9 = sshra.s32 %s1475_s7, 4  ;;  %s1799_s9 = int_to_ptr.hbm [resolvable:$true] %s1798_s9 }
  0x18   : > { %s1929_s28 = scalar_lea.vmem %s3143_s0, %s1543_s25  ;;  %s1800_s10 = scalar_lea.hbm %s1799_s9, 256 }
  0x19   : > { %v1932_v1 = vld [vmem:[%s1929_s28 + $0x20] sm:$0xff]  ;;  %v1935_v2 = vld [vmem:[%s1929_s28 + $0x10] sm:$0xff]  ;;  %v1944_v4 = vld [vmem:[%s1929_s28 + $0x28] sm:$0xff]  ;;  %p1801_p11 = scmp.ne.s32.totalorder %s1799_s9, %s1800_s10  ;;  %s1804_s19 = scalar_lea.hbm %s3146_s3, 512 }
  0x1a   : > { %v1938_v3 = vld [vmem:[%s1929_s28] sm:$0xff]  ;;  %219 = vperm.xlu2 %1645, %v1932_v1   ;;  %213 = vperm.xlu1 %1644, %v1935_v2   ;;  %v1947_v5 = vld [vmem:[%s1929_s28 + $0x18] sm:$0xff]  ;;  %v1950_v6 = vld [vmem:[%s1929_s28 + $0x8] sm:$0xff]  ;;  %p1805_p0 = scmp.lt.s32.totalorder %s1799_s9, %s3146_s3  ;;  %p1806_p1 = scmp.lt.s32.totalorder %s1804_s19, %s1800_s10 }
  0x1b   : > { %207 = vperm.xlu0 %1643, %v1938_v3   ;;  %v1956_v7 = vld [vmem:[%s1929_s28 + $0x40] sm:$0xff]  ;;  %v1959_v8 = vld [vmem:[%s1929_s28 + $0x38] sm:$0xff]  ;;  %v1962_v9 = vld [vmem:[%s1929_s28 + $0x30] sm:$0xff]  ;;  %p1802_p12 = pnand %p1801_p11, %p1912_p5 }
  0x1c   : > { %v1968_v10 = vld [vmem:[%s1929_s28 + $0x58] sm:$0xff]  ;;  %v1971_v11 = vld [vmem:[%s1929_s28 + $0x50] sm:$0xff]  ;;  %v1974_v12 = vld [vmem:[%s1929_s28 + $0x48] sm:$0xff]  ;;  %p1807_p2 = por %p1806_p1, %p1805_p0 }
  0x1d   : > { %v1980_v13 = vld [vmem:[%s1929_s28 + $0x70] sm:$0xff]  ;;  %v1983_v14 = vld [vmem:[%s1929_s28 + $0x68] sm:$0xff]  ;;  %v1986_v15 = vld [vmem:[%s1929_s28 + $0x60] sm:$0xff]  ;;  %p1803_p13 = pneg %p1802_p12 }
  0x1e   : > { %v1992_v16 = vld [vmem:[%s1929_s28 + $0x88] sm:$0xff]  ;;  %v1995_v17 = vld [vmem:[%s1929_s28 + $0x80] sm:$0xff]  ;;  %v1998_v18 = vld [vmem:[%s1929_s28 + $0x78] sm:$0xff] }
  0x1f   : > { %3155 = vst [vmem:[#allocation5_spill] sm:$0xff] %v1998_v18  ;;  %v2004_v19 = vld [vmem:[%s1929_s28 + $0xa0] sm:$0xff]  ;;  %v2007_v20 = vld [vmem:[%s1929_s28 + $0x98] sm:$0xff]  ;;  %v2010_v21 = vld [vmem:[%s1929_s28 + $0x90] sm:$0xff]  ;;  %p1808_p3 = pnand %p1807_p2, %p1803_p13 }
  0x20   : > { %v2016_v22 = vld [vmem:[%s1929_s28 + $0xb8] sm:$0xff]  ;;  %v2019_v23 = vld [vmem:[%s1929_s28 + $0xb0] sm:$0xff]  ;;  %v2022_v24 = vld [vmem:[%s1929_s28 + $0xa8] sm:$0xff] }
  0x21   : > { %v2028_v25 = vld [vmem:[%s1929_s28 + $0xd0] sm:$0xff]  ;;  %v2031_v26 = vld [vmem:[%s1929_s28 + $0xc8] sm:$0xff]  ;;  %v2034_v27 = vld [vmem:[%s1929_s28 + $0xc0] sm:$0xff] }
  0x22   : > { %222 = vperm.xlu2 %1645, %v1944_v4   ;;  %216 = vperm.xlu1 %1644, %v1947_v5   ;;  %v2040_v28 = vld [vmem:[%s1929_s28 + $0xe8] sm:$0xff]  ;;  %v2043_v29 = vld [vmem:[%s1929_s28 + $0xe0] sm:$0xff]  ;;  %v2046_v30 = vld [vmem:[%s1929_s28 + $0xd8] sm:$0xff] }
  0x23   : > { %210 = vperm.xlu0 %1643, %v1950_v6   ;;  %v2052_v31 = vld [vmem:[%s1929_s28 + $0xf8] sm:$0xff]  ;;  %v2055_v32 = vld [vmem:[%s1929_s28 + $0xf0] sm:$0xff]  ;;  %s1541_s28 = sshll.u32 %s162_s27, 8 }
  0x24   : > { %s3044_s29 = scalar_lea.vmem [#allocation2], %s1541_s28 }
  0x25   : > { %s1472_s16 = sshll.u32 %s3044_s29, 4  ;;  %s1473_s16 = int_to_ptr.vmem [resolvable:$true] %s1472_s16 }
  0x2a   : > { %231 = vperm.xlu2 %1645, %v1956_v7   ;;  %228 = vperm.xlu1 %1644, %v1959_v8  }
  0x2b   : > { %225 = vperm.xlu0 %1643, %v1962_v9  }
  0x32   : > { %240 = vperm.xlu2 %1645, %v1968_v10   ;;  %237 = vperm.xlu1 %1644, %v1971_v11  }
  0x33   : > { %234 = vperm.xlu0 %1643, %v1974_v12  }
  0x3a   : > { %249 = vperm.xlu2 %1645, %v1980_v13   ;;  %246 = vperm.xlu1 %1644, %v1983_v14  }
  0x3b   : > { %243 = vperm.xlu0 %1643, %v1986_v15  }
  0x42   : > { %258 = vperm.xlu2 %1645, %v1992_v16   ;;  %255 = vperm.xlu1 %1644, %v1995_v17  }
  0x43   : > { %252 = vperm.xlu0 %1643, %v1998_v18  }
  0x4a   : > { %267 = vperm.xlu2 %1645, %v2004_v19   ;;  %264 = vperm.xlu1 %1644, %v2007_v20  }
  0x4b   : > { %261 = vperm.xlu0 %1643, %v2010_v21  }
  0x52   : > { %276 = vperm.xlu2 %1645, %v2016_v22   ;;  %273 = vperm.xlu1 %1644, %v2019_v23  }
  0x53   : > { %270 = vperm.xlu0 %1643, %v2022_v24  }
  0x5a   : > { %285 = vperm.xlu2 %1645, %v2028_v25   ;;  %282 = vperm.xlu1 %1644, %v2031_v26  }
  0x5b   : > { %279 = vperm.xlu0 %1643, %v2034_v27  }
  0x62   : > { %294 = vperm.xlu2 %1645, %v2040_v28   ;;  %291 = vperm.xlu1 %1644, %v2043_v29  }
  0x63   : > { %288 = vperm.xlu0 %1643, %v2046_v30  }
  0x6a   : > { %1646 = vset.pattern.permute.xlu2 %v1849_v33  ;;  %300 = vperm.xlu1 %1644, %v2052_v31  }
  0x6b   : > { %297 = vperm.xlu0 %1643, %v2055_v32   ;;  %367 = vperm.xlu2 %1646, %v1938_v3  }
  0x72   : > { %1648 = vset.pattern.permute.xlu1 %v1849_v33 }
  0x73   : > { %1647 = vset.pattern.permute.xlu0 %v1849_v33  ;;  %373 = vperm.xlu1 %1648, %v1935_v2  }
  0x74   : > { %376 = vperm.xlu2 %1646, %v1947_v5   ;;  %370 = vperm.xlu0 %1647, %v1950_v6   ;;  %v2063_v34 = vpop.permute.xlu2 %219 }
  0x75   : > { %3156 = vst [vmem:[#allocation6_spill] sm:$0xff] %v2063_v34 }
  0x7b   : > { %379 = vperm.xlu1 %1648, %v1932_v1  }
  0x7c   : > { %382 = vperm.xlu2 %1646, %v1944_v4   ;;  %385 = vperm.xlu0 %1647, %v1962_v9   ;;  %v2068_v35 = vpop.permute.xlu2 %222 }
  0x7d   : > { %3157 = vst [vmem:[#allocation7_spill] sm:$0xff] %v2068_v35 }
  0x83   : > { %388 = vperm.xlu1 %1648, %v1959_v8  }
  0x84   : > { %391 = vperm.xlu2 %1646, %v1956_v7   ;;  %394 = vperm.xlu0 %1647, %v1974_v12   ;;  %v2073_v36 = vpop.permute.xlu2 %231 }
  0x85   : > { %3158 = vst [vmem:[#allocation8_spill] sm:$0xff] %v2073_v36 }
  0x8b   : > { %397 = vperm.xlu1 %1648, %v1971_v11  }
  0x8c   : > { %400 = vperm.xlu2 %1646, %v1968_v10   ;;  %403 = vperm.xlu0 %1647, %v1986_v15   ;;  %v2078_v37 = vpop.permute.xlu2 %240  ;;  %v2080_v38 = vpop.permute.xlu1 %213 }
  0x8d   : > { %3159 = vst [vmem:[#allocation9_spill] sm:$0xff] %v2078_v37  ;;  %v2082_v39 = vpop.permute.xlu0 %207 }
  0x8e   : > { %3160 = vst [vmem:[#allocation10_spill] sm:$0xff] %v2080_v38 }
  0x93   : > { %406 = vperm.xlu1 %1648, %v1983_v14  }
  0x94   : > { %409 = vperm.xlu2 %1646, %v1980_v13   ;;  %412 = vperm.xlu0 %1647, %v1998_v18   ;;  %v2087_v40 = vpop.permute.xlu2 %249  ;;  %v2089_v41 = vpop.permute.xlu1 %216 }
  0x95   : > { %3161 = vst [vmem:[#allocation11_spill] sm:$0xff] %v2087_v40  ;;  %v2091_v42 = vpop.permute.xlu0 %210 }
  0x96   : > { %3162 = vst [vmem:[#allocation12_spill] sm:$0xff] %v2089_v41 }
  0x97   : > { %3163 = vst [vmem:[#allocation13_spill] sm:$0xff] %v2091_v42 }
  0x9b   : > { %415 = vperm.xlu1 %1648, %v1995_v17  }
  0x9c   : > { %418 = vperm.xlu2 %1646, %v1992_v16   ;;  %421 = vperm.xlu0 %1647, %v2010_v21   ;;  %v2096_v43 = vpop.permute.xlu2 %258  ;;  %v2098_v44 = vpop.permute.xlu1 %228 }
  0x9d   : > { %3164 = vst [vmem:[#allocation14_spill] sm:$0xff] %v2098_v44  ;;  %v2100_v45 = vpop.permute.xlu0 %225 }
  0x9e   : > { %3165 = vst [vmem:[#allocation15_spill] sm:$0xff] %v2100_v45 }
  0xa3   : > { %424 = vperm.xlu1 %1648, %v2007_v20  }
  0xa4   : > { %427 = vperm.xlu2 %1646, %v2004_v19   ;;  %430 = vperm.xlu0 %1647, %v2022_v24   ;;  %v2105_v46 = vpop.permute.xlu2 %267  ;;  %v2107_v47 = vpop.permute.xlu1 %237 }
  0xa5   : > { %3166 = vst [vmem:[#allocation16_spill] sm:$0xff] %v2107_v47  ;;  %v2109_v48 = vpop.permute.xlu0 %234 }
  0xab   : > { %433 = vperm.xlu1 %1648, %v2019_v23  }
  0xac   : > { %436 = vperm.xlu2 %1646, %v2016_v22   ;;  %439 = vperm.xlu0 %1647, %v2034_v27   ;;  %v2114_v49 = vpop.permute.xlu2 %276  ;;  %v2116_v50 = vpop.permute.xlu1 %246 }
  0xad   : > { %3167 = vst [vmem:[#allocation17_spill] sm:$0xff] %v2116_v50  ;;  %v2118_v51 = vpop.permute.xlu0 %243 }
  0xb3   : > { %442 = vperm.xlu1 %1648, %v2031_v26  }
  0xb4   : > { %445 = vperm.xlu2 %1646, %v2028_v25   ;;  %448 = vperm.xlu0 %1647, %v2046_v30   ;;  %v2123_v52 = vpop.permute.xlu2 %285  ;;  %v2125_v53 = vpop.permute.xlu1 %255 }
  0xb5   : > { %v2127_v54 = vpop.permute.xlu0 %252 }
  0xbb   : > { %451 = vperm.xlu1 %1648, %v2043_v29  }
  0xbc   : > { %454 = vperm.xlu2 %1646, %v2040_v28   ;;  %457 = vperm.xlu0 %1647, %v2055_v32   ;;  %v2132_v55 = vpop.permute.xlu2 %294  ;;  %v2134_v56 = vpop.permute.xlu1 %264 }
  0xbd   : > { %v2136_v57 = vpop.permute.xlu0 %261 }
  0xc3   : > { %460 = vperm.xlu1 %1648, %v2052_v31  }
  0xc4   : > { %1649 = vset.pattern.permute.xlu2 %v1850_v58  ;;  %1650 = vset.pattern.permute.xlu0 %v1850_v58  ;;  %v2139_v59 = vpop.permute.xlu1 %273 }
  0xc5   : > { %559 = vperm.xlu2 %1649, %v1938_v3   ;;  %562 = vperm.xlu0 %1650, %v1950_v6   ;;  %v2143_v60 = vpop.permute.xlu0 %270  ;;  %v2145_v61 = vpop.permute.xlu2 %367 }
  0xcb   : > { %1651 = vset.pattern.permute.xlu1 %v1850_v58 }
  0xcc   : > { %565 = vperm.xlu1 %1651, %v1935_v2   ;;  %v2148_v62 = vpop.permute.xlu1 %282 }
  0xcd   : > { %3168 = vst [vmem:[#allocation18_spill] sm:$0xff] %v2148_v62  ;;  %568 = vperm.xlu2 %1649, %v1947_v5   ;;  %577 = vperm.xlu0 %1650, %v1962_v9   ;;  %v2152_v63 = vpop.permute.xlu0 %279 }
  0xce   : > { %3169 = vst [vmem:[#allocation19_spill] sm:$0xff] %v2152_v63  ;;  %v2154_v33 = vpop.permute.xlu2 %376 }
  0xcf   : > { %3170 = vst [vmem:[#allocation20_spill] sm:$0xff] %v2154_v33 }
  0xd4   : > { %571 = vperm.xlu1 %1651, %v1932_v1   ;;  %v2157_v0 = vpop.permute.xlu1 %291 }
  0xd5   : > { %3171 = vst [vmem:[#allocation21_spill] sm:$0xff] %v2157_v0  ;;  %574 = vperm.xlu2 %1649, %v1944_v4   ;;  %586 = vperm.xlu0 %1650, %v1974_v12   ;;  %v2161_v58 = vpop.permute.xlu0 %288 }
  0xd6   : > { %3172 = vst [vmem:[#allocation22_spill] sm:$0xff] %v2161_v58  ;;  %v2163_v40 = vpop.permute.xlu2 %382 }
  0xd7   : > { %3173 = vst [vmem:[#allocation23_spill] sm:$0xff] %v2163_v40 }
  0xdc   : > { %580 = vperm.xlu1 %1651, %v1959_v8   ;;  %v2166_v50 = vpop.permute.xlu1 %300 }
  0xdd   : > { %3174 = vst [vmem:[#allocation24_spill] sm:$0xff] %v2166_v50  ;;  %583 = vperm.xlu2 %1649, %v1956_v7   ;;  %595 = vperm.xlu0 %1650, %v1986_v15   ;;  %v2170_v37 = vpop.permute.xlu0 %297 }
  0xde   : > { %3175 = vst [vmem:[#allocation25_spill] sm:$0xff] %v2170_v37  ;;  %v2172_v47 = vpop.permute.xlu2 %391 }
  0xdf   : > { %3176 = vst [vmem:[#allocation26_spill] sm:$0xff] %v2172_v47 }
  0xe4   : > { %589 = vperm.xlu1 %1651, %v1971_v11  }
  0xe5   : > { %592 = vperm.xlu2 %1649, %v1968_v10   ;;  %604 = vperm.xlu0 %1650, %v1998_v18   ;;  %v2177_v44 = vpop.permute.xlu1 %373 }
  0xe6   : > { %3177 = vst [vmem:[#allocation27_spill] sm:$0xff] %v2177_v44  ;;  %v2179_v62 = vpop.permute.xlu2 %400  ;;  %v2181_v45 = vpop.permute.xlu0 %370 }
  0xe7   : > { %3178 = vst [vmem:[#allocation28_spill] sm:$0xff] %v2179_v62 }
  0xe8   : > { %3179 = vst [vmem:[#allocation29_spill] sm:$0xff] %v2181_v45 }
  0xec   : > { %598 = vperm.xlu1 %1651, %v1983_v14  }
  0xed   : > { %601 = vperm.xlu2 %1649, %v1980_v13   ;;  %613 = vperm.xlu0 %1650, %v2010_v21   ;;  %v2186_v35 = vpop.permute.xlu1 %379 }
  0xee   : > { %3180 = vst [vmem:[#allocation30_spill] sm:$0xff] %v2186_v35  ;;  %v2188_v40 = vpop.permute.xlu2 %409  ;;  %v2190_v34 = vpop.permute.xlu0 %385 }
  0xef   : > { %3181 = vst [vmem:[#allocation31_spill] sm:$0xff] %v2188_v40 }
  0xf0   : > { %3182 = vst [vmem:[#allocation32_spill] sm:$0xff] %v2190_v34 }
  0xf4   : > { %607 = vperm.xlu1 %1651, %v1995_v17  }
  0xf5   : > { %610 = vperm.xlu2 %1649, %v1992_v16   ;;  %622 = vperm.xlu0 %1650, %v2022_v24   ;;  %v2195_v62 = vpop.permute.xlu1 %388 }
  0xf6   : > { %3183 = vst [vmem:[#allocation33_spill] sm:$0xff] %v2195_v62  ;;  %v2197_v41 = vpop.permute.xlu2 %418  ;;  %v2199_v33 = vpop.permute.xlu0 %394 }
  0xfc   : > { %616 = vperm.xlu1 %1651, %v2007_v20  }
  0xfd   : > { %619 = vperm.xlu2 %1649, %v2004_v19   ;;  %631 = vperm.xlu0 %1650, %v2034_v27   ;;  %v2204_v40 = vpop.permute.xlu1 %397 }
  0xfe   : > { %3184 = vst [vmem:[#allocation34_spill] sm:$0xff] %v2204_v40  ;;  %v2206_v34 = vpop.permute.xlu2 %427  ;;  %v2208_v35 = vpop.permute.xlu0 %403 }
 0x104   : > { %625 = vperm.xlu1 %1651, %v2019_v23  }
 0x105   : > { %628 = vperm.xlu2 %1649, %v2016_v22   ;;  %640 = vperm.xlu0 %1650, %v2046_v30   ;;  %v2213_v62 = vpop.permute.xlu1 %406 }
 0x106   : > { %3185 = vst [vmem:[#allocation35_spill] sm:$0xff] %v2213_v62  ;;  %v2215_v63 = vpop.permute.xlu2 %436  ;;  %v2217_v38 = vpop.permute.xlu0 %412  ;;  %v1851_v62 = vmov 3  }
 0x10c   : > { %634 = vperm.xlu1 %1651, %v2031_v26  }
 0x10d   : > { %637 = vperm.xlu2 %1649, %v2028_v25   ;;  %649 = vperm.xlu0 %1650, %v2055_v32   ;;  %v2222_v40 = vpop.permute.xlu1 %415 }
 0x10e   : > { %v2224_v44 = vpop.permute.xlu2 %445  ;;  %v2226_v50 = vpop.permute.xlu0 %421 }
 0x114   : > { %643 = vperm.xlu1 %1651, %v2043_v29  }
 0x115   : > { %646 = vperm.xlu2 %1649, %v2040_v28   ;;  %1653 = vset.pattern.permute.xlu0 %v1851_v62  ;;  %v2230_v36 = vpop.permute.xlu1 %424 }
 0x116   : > { %v2232_v47 = vpop.permute.xlu2 %454  ;;  %754 = vperm.xlu0 %1653, %v1950_v6   ;;  %v2235_v0 = vpop.permute.xlu0 %430 }
 0x11c   : > { %652 = vperm.xlu1 %1651, %v2052_v31  }
 0x11d   : > { %1652 = vset.pattern.permute.xlu2 %v1851_v62  ;;  %v2238_v42 = vpop.permute.xlu1 %433 }
 0x11e   : > { %751 = vperm.xlu2 %1652, %v1938_v3   ;;  %769 = vperm.xlu0 %1653, %v1962_v9   ;;  %v2242_v45 = vpop.permute.xlu0 %439 }
 0x11f   : > { %v2244_v37 = vpop.permute.xlu2 %559 }
 0x124   : > { %1654 = vset.pattern.permute.xlu1 %v1851_v62  ;;  %v204_v62 = vlaneseq }
 0x125   : > { %757 = vperm.xlu1 %1654, %v1935_v2   ;;  %v2247_v18 = vpop.permute.xlu1 %442 }
 0x126   : > { %3186 = vst [vmem:[#allocation36_spill] sm:$0xff] %v2247_v18  ;;  %760 = vperm.xlu2 %1652, %v1947_v5   ;;  %778 = vperm.xlu0 %1653, %v1974_v12   ;;  %v2251_v6 = vpop.permute.xlu0 %448 }
 0x127   : > { %v2253_v58 = vpop.permute.xlu2 %568 }
 0x12d   : > { %763 = vperm.xlu1 %1654, %v1932_v1   ;;  %v2256_v3 = vpop.permute.xlu1 %451 }
 0x12e   : > { %766 = vperm.xlu2 %1652, %v1944_v4   ;;  %802 = vperm.xlu0 %1653, %v1992_v16   ;;  %v2260_v9 = vpop.permute.xlu0 %457 }
 0x12f   : > { %v2262_v2 = vpop.permute.xlu2 %574 }
 0x135   : > { %772 = vperm.xlu1 %1654, %v1959_v8   ;;  %v2265_v5 = vpop.permute.xlu1 %460 }
 0x136   : > { %775 = vperm.xlu2 %1652, %v1956_v7   ;;  %829 = vperm.xlu0 %1653, %v2028_v25   ;;  %v989_v7 = vld [vmem:[%s3144_s1 + $0x78] sm:$0xff]  ;;  %v2285_v25 = vand.u32 127, %v204_v62  ;;  %v3189_v62 = vmov 0  }
 0x137   : > { %v2269_v12 = vpop.permute.xlu2 %583  ;;  %v2271_v1 = vpop.permute.xlu0 %562  ;;  %994 = vmatpush.msra.mxu0 %v989_v7  ;;  %1550 = vmatpush.msra.mxu1 %v989_v7 }
 0x138   : > { %1552 = vmatpush.msra.mxu3 %v989_v7  ;;  %1551 = vmatpush.msra.mxu2 %v989_v7  ;;  %vm471_vm0 = vcmp.eq.s32.totalorder %v2199_v33, %v2285_v25  ;;  %vm311_vm1 = vcmp.eq.s32.totalorder %v2109_v48, %v2285_v25  ;;  %vm479_vm3 = vcmp.eq.s32.totalorder %v2197_v41, %v2285_v25 }
 0x139   : > { %v503_v7 = vsel %vm471_vm0, 1, %v3189_v62  ;;  %vm474_vm4 = vcmp.eq.s32.totalorder %v2208_v35, %v2285_v25  ;;  %vm319_vm5 = vcmp.eq.s32.totalorder %v2096_v43, %v2285_v25  ;;  %vm314_vm6 = vcmp.eq.s32.totalorder %v2118_v51, %v2285_v25 }
 0x13a   : > { %v511_v41 = vsel %vm479_vm3, 1, %v3189_v62  ;;  %v506_v35 = vsel %vm474_vm4, 1, %v3189_v62  ;;  %v351_v43 = vsel %vm319_vm5, 1, %v3189_v62  ;;  %vm482_vm9 = vcmp.eq.s32.totalorder %v2206_v34, %v2285_v25 }
 0x13b   : > { %vm477_vm10 = vcmp.eq.s32.totalorder %v2217_v38, %v2285_v25  ;;  %vm322_vm11 = vcmp.eq.s32.totalorder %v2105_v46, %v2285_v25  ;;  %vm317_vm12 = vcmp.eq.s32.totalorder %v2127_v54, %v2285_v25  ;;  %v514_v38 = vsel %vm482_vm9, 1, %v3189_v62 }
 0x13c   : > { %v354_v46 = vsel %vm322_vm11, 1, %v3189_v62  ;;  %v349_v34 = vsel %vm317_vm12, 1, %v3189_v62  ;;  %vm485_vm15 = vcmp.eq.s32.totalorder %v2215_v63, %v2285_v25  ;;  %vm480_vm0 = vcmp.eq.s32.totalorder %v2226_v50, %v2285_v25 }
 0x13d   : > { %799 = vperm.xlu1 %1654, %v1995_v17   ;;  %v988_v17 = vld [vmem:[%s3144_s1 + $0x70] sm:$0xff]  ;;  %v517_v50 = vsel %vm485_vm15, 1, %v3189_v62  ;;  %vm478_vm5 = vcmp.eq.s32.totalorder %v2222_v40, %v2285_v25  ;;  %vm318_vm9 = vcmp.eq.s32.totalorder %v2125_v53, %v2285_v25  ;;  %vm491_vm15 = vcmp.eq.s32.totalorder %v2232_v47, %v2285_v25 }
 0x13e   : > { %823 = vperm.xlu2 %1652, %v2034_v27   ;;  %832 = vperm.xlu0 %1653, %v2046_v30   ;;  %v2276_v4 = vpop.permute.xlu1 %565  ;;  %v987_v27 = vld [vmem:[%s3144_s1 + $0x68] sm:$0xff]  ;;  %v986_v30 = vld [vmem:[%s3144_s1 + $0x60] sm:$0xff]  ;;  %v510_v40 = vsel %vm478_vm5, 1, %v3189_v62  ;;  %vm484_vm5 = vcmp.eq.s32.totalorder %v2238_v42, %v2285_v25 }
 0x13f   : > { %v2278_v8 = vpop.permute.xlu2 %592  ;;  %v2280_v16 = vpop.permute.xlu0 %577  ;;  %995 = vmatpush.msra.mxu0 %v988_v17  ;;  %1553 = vmatpush.msra.mxu1 %v988_v17 }
 0x140   : > { %3187 = vst [vmem:[#allocation37_spill] sm:$0xff] %v2278_v8  ;;  %1555 = vmatpush.msra.mxu3 %v988_v17  ;;  %1554 = vmatpush.msra.mxu2 %v988_v17  ;;  %v343_v17 = vsel %vm311_vm1, 1, %v3189_v62  ;;  %vm325_vm1 = vcmp.eq.s32.totalorder %v2114_v49, %v2285_v25 }
 0x141   : > { %3188 = vst [vmem:[#allocation38_spill] sm:$0xff] %v2280_v16  ;;  %996 = vmatpush.msra.mxu0 %v987_v27  ;;  %1556 = vmatpush.msra.mxu1 %v987_v27  ;;  %v985_v16 = vld [vmem:[%s3144_s1 + $0x58] sm:$0xff]  ;;  %v535_v18 = vadd.s32 %v503_v7, %v343_v17  ;;  %v357_v49 = vsel %vm325_vm1, 1, %v3189_v62  ;;  %vm331_vm1 = vcmp.eq.s32.totalorder %v2132_v55, %v2285_v25 }
 0x142   : > { %1558 = vmatpush.msra.mxu3 %v987_v27  ;;  %1557 = vmatpush.msra.mxu2 %v987_v27  ;;  %v346_v27 = vsel %vm314_vm6, 1, %v3189_v62  ;;  %vm488_vm6 = vcmp.eq.s32.totalorder %v2224_v44, %v2285_v25 }
 0x143   : > { %997 = vmatpush.msra.mxu0 %v986_v30  ;;  %1559 = vmatpush.msra.mxu1 %v986_v30 }
 0x144   : > { %1561 = vmatpush.msra.mxu3 %v986_v30  ;;  %1560 = vmatpush.msra.mxu2 %v986_v30  ;;  %v543_v30 = vadd.s32 %v511_v41, %v351_v43  ;;  %v978_v43 = vld [vmem:[%s3144_s1 + $0x20] sm:$0xff] }
 0x145   : > { %826 = vperm.xlu1 %1654, %v2031_v26   ;;  %998 = vmatpush.msra.mxu0 %v985_v16  ;;  %v984_v26 = vld [vmem:[%s3144_s1 + $0x50] sm:$0xff] }
 0x146   : > { %805 = vperm.xlu2 %1652, %v2010_v21   ;;  %835 = vperm.xlu0 %1653, %v2043_v29   ;;  %v2304_v33 = vpop.permute.xlu1 %571 }
 0x147   : > { %v2307_v48 = vpop.permute.xlu2 %601  ;;  %v587_v8 = vpop.permute.xlu0 %586  ;;  %1562 = vmatpush.msra.mxu1 %v985_v16  ;;  %1564 = vmatpush.msra.mxu3 %v985_v16 }
 0x148   : > { %vm663_vm2 = vcmp.eq.s32.totalorder %v587_v8, %v2285_v25  ;;  %v983_v8 = vld [vmem:[%s3144_s1 + $0x48] sm:$0xff]  ;;  %999 = vmatpush.msra.mxu0 %v984_v26  ;;  %1563 = vmatpush.msra.mxu2 %v985_v16  ;;  %v981_v16 = vld [vmem:[%s3144_s1 + $0x38] sm:$0xff] }
 0x149   : > { %v695_v21 = vsel %vm663_vm2, 1, %v3189_v62  ;;  %1565 = vmatpush.msra.mxu1 %v984_v26  ;;  %1567 = vmatpush.msra.mxu3 %v984_v26  ;;  %vm320_vm2 = vcmp.eq.s32.totalorder %v2136_v57, %v2285_v25 }
 0x14a   : > { %v2321_v29 = vadd.s32 %v695_v21, %v535_v18  ;;  %v982_v18 = vld [vmem:[%s3144_s1 + $0x40] sm:$0xff]  ;;  %1000 = vmatpush.msra.mxu0 %v983_v8  ;;  %1566 = vmatpush.msra.mxu2 %v984_v26  ;;  %v980_v21 = vld [vmem:[%s3144_s1 + $0x30] sm:$0xff]  ;;  %v979_v26 = vld [vmem:[%s3144_s1 + $0x28] sm:$0xff]  ;;  %v352_v63 = vsel %vm320_vm2, 1, %v3189_v62 }
 0x14b   : > { %1568 = vmatpush.msra.mxu1 %v983_v8  ;;  %1570 = vmatpush.msra.mxu3 %v983_v8 }
 0x14c   : > { %1001 = vmatpush.msra.mxu0 %v982_v18  ;;  %1569 = vmatpush.msra.mxu2 %v983_v8  ;;  %v509_v8 = vsel %vm477_vm10, 1, %v3189_v62  ;;  %vm323_vm10 = vcmp.eq.s32.totalorder %v2143_v60, %v2285_v25 }
 0x14d   : > { %781 = vperm.xlu1 %1654, %v1971_v11   ;;  %v538_v11 = vadd.s32 %v506_v35, %v346_v27  ;;  %1571 = vmatpush.msra.mxu1 %v982_v18  ;;  %v546_v27 = vadd.s32 %v514_v38, %v354_v46  ;;  %v549_v38 = vadd.s32 %v517_v50, %v357_v49  ;;  %v355_v60 = vsel %vm323_vm10, 1, %v3189_v62 }
 0x14e   : > { %808 = vperm.xlu2 %1652, %v2007_v20   ;;  %838 = vperm.xlu0 %1653, %v2040_v28   ;;  %v2339_v51 = vpop.permute.xlu1 %580  ;;  %v523_v50 = vsel %vm491_vm15, 1, %v3189_v62 }
 0x14f   : > { %v611_v7 = vpop.permute.xlu2 %610  ;;  %v596_v17 = vpop.permute.xlu0 %595  ;;  %1002 = vmatpush.msra.mxu0 %v981_v16  ;;  %1573 = vmatpush.msra.mxu3 %v982_v18 }
 0x150   : > { %vm671_vm7 = vcmp.eq.s32.totalorder %v611_v7, %v2285_v25  ;;  %vm666_vm8 = vcmp.eq.s32.totalorder %v596_v17, %v2285_v25  ;;  %1574 = vmatpush.msra.mxu1 %v981_v16  ;;  %1572 = vmatpush.msra.mxu2 %v982_v18  ;;  %v977_v18 = vld [vmem:[%s3144_s1 + $0x18] sm:$0xff]  ;;  %v976_v17 = vld [vmem:[%s3144_s1 + $0x10] sm:$0xff] }
 0x151   : > { %v703_v20 = vsel %vm671_vm7, 1, %v3189_v62  ;;  %v698_v28 = vsel %vm666_vm8, 1, %v3189_v62  ;;  %1003 = vmatpush.msra.mxu0 %v980_v21  ;;  %1576 = vmatpush.msra.mxu3 %v981_v16  ;;  %vm483_vm7 = vcmp.eq.s32.totalorder %v2235_v0, %v2285_v25  ;;  %vm328_vm8 = vcmp.eq.s32.totalorder %v2123_v52, %v2285_v25 }
 0x152   : > { %v2356_v41 = vadd.s32 %v703_v20, %v543_v30  ;;  %v2358_v35 = vadd.s32 %v698_v28, %v538_v11  ;;  %1577 = vmatpush.msra.mxu1 %v980_v21  ;;  %1575 = vmatpush.msra.mxu2 %v981_v16  ;;  %v975_v16 = vld [vmem:[%s3144_s1 + $0x8] sm:$0xff]  ;;  %v974_v28 = vld [vmem:[%s3144_s1] sm:$0xff]  ;;  %v520_v0 = vsel %vm488_vm6, 1, %v3189_v62  ;;  %v515_v44 = vsel %vm483_vm7, 1, %v3189_v62 }
 0x153   : > { %1004 = vmatpush.msra.mxu0 %v979_v26  ;;  %1579 = vmatpush.msra.mxu3 %v980_v21  ;;  %v360_v52 = vsel %vm328_vm8, 1, %v3189_v62  ;;  %vm489_vm6 = vcmp.eq.s32.totalorder %v2251_v6, %v2285_v25  ;;  %vm302_vm7 = vcmp.eq.s32.totalorder %v2082_v39, %v2285_v25  ;;  %vm324_vm8 = vcmp.eq.s32.totalorder %v2139_v59, %v2285_v25 }
 0x154   : > { %1580 = vmatpush.msra.mxu1 %v979_v26  ;;  %1578 = vmatpush.msra.mxu2 %v980_v21  ;;  %v512_v21 = vsel %vm480_vm0, 1, %v3189_v62  ;;  %vm321_vm0 = vcmp.eq.s32.totalorder %v2134_v56, %v2285_v25  ;;  %v521_v6 = vsel %vm489_vm6, 1, %v3189_v62  ;;  %v356_v39 = vsel %vm324_vm8, 1, %v3189_v62 }
 0x155   : > { %784 = vperm.xlu1 %1654, %v1968_v10   ;;  %1005 = vmatpush.msra.mxu0 %v978_v43  ;;  %v541_v10 = vadd.s32 %v509_v8, %v349_v34  ;;  %vm493_vm8 = vcmp.eq.s32.totalorder %v2265_v5, %v2285_v25 }
 0x156   : > { %811 = vperm.xlu2 %1652, %v2004_v19   ;;  %841 = vperm.xlu0 %1653, %v2055_v32   ;;  %v2379_v54 = vpop.permute.xlu1 %589  ;;  %v525_v5 = vsel %vm493_vm8, 1, %v3189_v62 }
 0x157   : > { %v620_v30 = vpop.permute.xlu2 %619  ;;  %v605_v7 = vpop.permute.xlu0 %604  ;;  %1006 = vmatpush.msra.mxu0 %v977_v18  ;;  %1582 = vmatpush.msra.mxu3 %v979_v26 }
 0x158   : > { %vm674_vm13 = vcmp.eq.s32.totalorder %v620_v30, %v2285_v25  ;;  %vm669_vm14 = vcmp.eq.s32.totalorder %v605_v7, %v2285_v25  ;;  %1583 = vmatpush.msra.mxu1 %v978_v43  ;;  %1581 = vmatpush.msra.mxu2 %v979_v26  ;;  %v544_v26 = vadd.s32 %v512_v21, %v352_v63  ;;  %v363_v21 = vsel %vm331_vm1, 1, %v3189_v62 }
 0x159   : > { %v706_v19 = vsel %vm674_vm13, 1, %v3189_v62  ;;  %v701_v32 = vsel %vm669_vm14, 1, %v3189_v62  ;;  %1007 = vmatpush.msra.mxu0 %v976_v17  ;;  %1585 = vmatpush.msra.mxu3 %v978_v43  ;;  %v552_v30 = vadd.s32 %v520_v0, %v360_v52  ;;  %vm481_vm14 = vcmp.eq.s32.totalorder %v2230_v36, %v2285_v25 }
 0x15a   : > { %v2396_v11 = vadd.s32 %v706_v19, %v546_v27  ;;  %v2398_v20 = vadd.s32 %v701_v32, %v541_v10  ;;  %1586 = vmatpush.msra.mxu1 %v977_v18  ;;  %1584 = vmatpush.msra.mxu2 %v978_v43  ;;  %v350_v43 = vsel %vm318_vm9, 1, %v3189_v62  ;;  %v547_v10 = vadd.s32 %v515_v44, %v355_v60 }
 0x15b   : > { %1008 = vmatpush.msra.mxu0 %v975_v16  ;;  %1588 = vmatpush.msra.mxu3 %v977_v18  ;;  %v542_v27 = vadd.s32 %v510_v40, %v350_v43  ;;  %v513_v36 = vsel %vm481_vm14, 1, %v3189_v62  ;;  %v555_v55 = vadd.s32 %v523_v50, %v363_v21  ;;  %vm654_vm9 = vcmp.eq.s32.totalorder %v2244_v37, %v2285_v25  ;;  %v3193_v21 = vld [vmem:[#allocation29_spill] sm:$0xff] }
 0x15c   : > { %1589 = vmatpush.msra.mxu1 %v976_v17  ;;  %1587 = vmatpush.msra.mxu2 %v977_v18  ;;  %v686_v59 = vsel %vm654_vm9, 1, %v3189_v62  ;;  %vm492_vm14 = vcmp.eq.s32.totalorder %v2260_v9, %v2285_v25  ;;  %vm463_vm1 = vcmp.eq.s32.totalorder %v3193_v21, %v2285_v25 }
 0x15d   : > { %787 = vperm.xlu1 %1654, %v1986_v15   ;;  %1009 = vmatpush.msra.mxu0 %v974_v28 }
 0x15e   : > { %814 = vperm.xlu2 %1652, %v2022_v24   ;;  %844 = vperm.xlu0 %1653, %v2052_v31   ;;  %v2419_v57 = vpop.permute.xlu1 %598 }
 0x15f   : > { %v629_v8 = vpop.permute.xlu2 %628  ;;  %v614_v46 = vpop.permute.xlu0 %613  ;;  %1591 = vmatpush.msra.mxu3 %v976_v17  ;;  %1592 = vmatpush.msra.mxu1 %v975_v16 }
 0x160   : > { %vm677_vm3 = vcmp.eq.s32.totalorder %v629_v8, %v2285_v25  ;;  %vm672_vm4 = vcmp.eq.s32.totalorder %v614_v46, %v2285_v25  ;;  %1590 = vmatpush.msra.mxu2 %v976_v17  ;;  %v516_v46 = vsel %vm484_vm5, 1, %v3189_v62  ;;  %vm655_vm5 = vcmp.eq.s32.totalorder %v2271_v1, %v2285_v25 }
 0x161   : > { %v709_v15 = vsel %vm677_vm3, 1, %v3189_v62  ;;  %v704_v24 = vsel %vm672_vm4, 1, %v3189_v62  ;;  %1594 = vmatpush.msra.mxu3 %v975_v16  ;;  %1595 = vmatpush.msra.mxu1 %v974_v28  ;;  %vm462_vm4 = vcmp.eq.s32.totalorder %v2145_v61, %v2285_v25  ;;  %v3190_v61 = vld [vmem:[#allocation22_spill] sm:$0xff]  ;;  %v548_v0 = vadd.s32 %v516_v46, %v356_v39 }
 0x162   : > { %v2432_v31 = vadd.s32 %v709_v15, %v549_v38  ;;  %v2434_v34 = vadd.s32 %v704_v24, %v544_v26  ;;  %1593 = vmatpush.msra.mxu2 %v975_v16  ;;  %v494_v42 = vsel %vm462_vm4, 1, %v3189_v62  ;;  %vm329_vm10 = vcmp.eq.s32.totalorder %v3190_v61, %v2285_v25  ;;  %v3191_v26 = vld [vmem:[#allocation5_spill] sm:$0xff]  ;;  %v3196_v39 = vld [vmem:[#allocation26_spill] sm:$0xff] }
 0x163   : > { %1597 = vmatpush.msra.mxu3 %v974_v28  ;;  %v334_v15 = vsel %vm302_vm7, 1, %v3189_v62  ;;  %v361_v37 = vsel %vm329_vm10, 1, %v3189_v62  ;;  %v687_v46 = vsel %vm655_vm5, 1, %v3189_v62  ;;  %vm470_vm7 = vcmp.eq.s32.totalorder %v3196_v39, %v2285_v25 }
 0x164   : > { %1596 = vmatpush.msra.mxu2 %v974_v28  ;;  %v353_v28 = vsel %vm321_vm0, 1, %v3189_v62  ;;  %v526_v40 = vadd.s32 %v494_v42, %v334_v15  ;;  %v553_v52 = vadd.s32 %v521_v6, %v361_v37 }
 0x165   : > { %790 = vperm.xlu1 %1654, %v1983_v14   ;;  %v545_v49 = vadd.s32 %v513_v36, %v353_v28 }
 0x166   : > { %817 = vperm.xlu2 %1652, %v2019_v23   ;;  %v608_v53 = vpop.permute.xlu1 %607  ;;  %v718_v60 = vadd.s32 %v686_v59, %v526_v40 }
 0x167   : > { %vm670_vm11 = vcmp.eq.s32.totalorder %v608_v53, %v2285_v25  ;;  %v638_v7 = vpop.permute.xlu2 %637  ;;  %v623_v18 = vpop.permute.xlu0 %622 }
 0x168   : > { %v702_v14 = vsel %vm670_vm11, 1, %v3189_v62  ;;  %vm680_vm12 = vcmp.eq.s32.totalorder %v638_v7, %v2285_v25  ;;  %vm675_vm13 = vcmp.eq.s32.totalorder %v623_v18, %v2285_v25 }
 0x169   : > { %v2456_v23 = vadd.s32 %v702_v14, %v542_v27  ;;  %v712_v19 = vsel %vm680_vm12, 1, %v3189_v62  ;;  %v707_v32 = vsel %vm675_vm13, 1, %v3189_v62  ;;  %v3192_v14 = vld [vmem:[#allocation25_spill] sm:$0xff] }
 0x16a   : > { %v2462_v17 = vadd.s32 %v712_v19, %v552_v30  ;;  %v2464_v16 = vadd.s32 %v707_v32, %v547_v10  ;;  %vm332_vm15 = vcmp.eq.s32.totalorder %v3192_v14, %v2285_v25  ;;  %v524_v19 = vsel %vm492_vm14, 1, %v3189_v62 }
 0x16b   : > { %v364_v50 = vsel %vm332_vm15, 1, %v3189_v62  ;;  %vm486_vm15 = vcmp.eq.s32.totalorder %v2242_v45, %v2285_v25 }
 0x16d   : > { %793 = vperm.xlu1 %1654, %v1980_v13  }
 0x16e   : > { %820 = vperm.xlu2 %1652, %v2016_v22   ;;  %v617_v47 = vpop.permute.xlu1 %616 }
 0x16f   : > { %vm673_vm2 = vcmp.eq.s32.totalorder %v617_v47, %v2285_v25  ;;  %v647_v56 = vpop.permute.xlu2 %646  ;;  %v2477_v63 = vpop.permute.xlu0 %631  ;;  %v556_v47 = vadd.s32 %v524_v19, %v364_v50 }
 0x170   : > { %v705_v38 = vsel %vm673_vm2, 1, %v3189_v62  ;;  %vm683_vm3 = vcmp.eq.s32.totalorder %v647_v56, %v2285_v25  ;;  %vm490_vm2 = vcmp.eq.s32.totalorder %v2256_v3, %v2285_v25 }
 0x171   : > { %v2485_v13 = vadd.s32 %v705_v38, %v545_v49  ;;  %v715_v22 = vsel %vm683_vm3, 1, %v3189_v62  ;;  %v3195_v38 = vld [vmem:[#allocation21_spill] sm:$0xff]  ;;  %v522_v42 = vsel %vm490_vm2, 1, %v3189_v62  ;;  %vm656_vm2 = vcmp.eq.s32.totalorder %v2276_v4, %v2285_v25 }
 0x172   : > { %v2490_v8 = vadd.s32 %v715_v22, %v555_v55  ;;  %v3194_v55 = vld [vmem:[#allocation13_spill] sm:$0xff]  ;;  %vm330_vm4 = vcmp.eq.s32.totalorder %v3195_v38, %v2285_v25  ;;  %v495_v22 = vsel %vm463_vm1, 1, %v3189_v62  ;;  %v688_v4 = vsel %vm656_vm2, 1, %v3189_v62 }
 0x173   : > { %vm303_vm3 = vcmp.eq.s32.totalorder %v3194_v55, %v2285_v25  ;;  %v362_v3 = vsel %vm330_vm4, 1, %v3189_v62  ;;  %v3200_v55 = vld [vmem:[#allocation10_spill] sm:$0xff]  ;;  %vm678_vm4 = vcmp.eq.s32.totalorder %v2477_v63, %v2285_v25  ;;  %vm659_vm2 = vcmp.eq.s32.totalorder %v2262_v2, %v2285_v25 }
 0x174   : > { %v335_v61 = vsel %vm303_vm3, 1, %v3189_v62  ;;  %v554_v15 = vadd.s32 %v522_v42, %v362_v3  ;;  %vm304_vm1 = vcmp.eq.s32.totalorder %v3200_v55, %v2285_v25  ;;  %v710_v39 = vsel %vm678_vm4, 1, %v3189_v62 }
 0x175   : > { %796 = vperm.xlu1 %1654, %v3191_v26   ;;  %v527_v26 = vadd.s32 %v495_v22, %v335_v61  ;;  %v3201_v22 = vld [vmem:[#allocation19_spill] sm:$0xff]  ;;  %v518_v61 = vsel %vm486_vm15, 1, %v3189_v62  ;;  %v336_v3 = vsel %vm304_vm1, 1, %v3189_v62 }
 0x176   : > { %v626_v24 = vpop.permute.xlu1 %625  ;;  %vm326_vm3 = vcmp.eq.s32.totalorder %v3201_v22, %v2285_v25 }
 0x177   : > { %vm676_vm11 = vcmp.eq.s32.totalorder %v626_v24, %v2285_v25  ;;  %v641_v44 = vpop.permute.xlu0 %640  ;;  %v719_v40 = vadd.s32 %v687_v46, %v527_v26  ;;  %v3202_v46 = vld [vmem:[#allocation20_spill] sm:$0xff]  ;;  %v358_v26 = vsel %vm326_vm3, 1, %v3189_v62 }
 0x178   : > { %v708_v43 = vsel %vm676_vm11, 1, %v3189_v62  ;;  %vm681_vm12 = vcmp.eq.s32.totalorder %v641_v44, %v2285_v25  ;;  %v752_v53 = vpop.permute.xlu2 %751  ;;  %v3197_v44 = vld [vmem:[#allocation8_spill] sm:$0xff]  ;;  %vm465_vm5 = vcmp.eq.s32.totalorder %v3202_v46, %v2285_v25  ;;  %v550_v63 = vadd.s32 %v518_v61, %v358_v26 }
 0x179   : > { %v2511_v27 = vadd.s32 %v708_v43, %v548_v0  ;;  %v713_v30 = vsel %vm681_vm12, 1, %v3189_v62  ;;  %vm846_vm13 = vcmp.eq.s32.totalorder %v752_v53, %v2285_v25  ;;  %vm310_vm10 = vcmp.eq.s32.totalorder %v3197_v44, %v2285_v25 }
 0x17a   : > { %v2517_v7 = vadd.s32 %v713_v30, %v553_v52  ;;  %v878_v18 = vsel %vm846_vm13, 1, %v3189_v62  ;;  %v3198_v52 = vld [vmem:[#allocation24_spill] sm:$0xff]  ;;  %vm662_vm12 = vcmp.eq.s32.totalorder %v2269_v12, %v2285_v25  ;;  %v502_v53 = vsel %vm470_vm7, 1, %v3189_v62  ;;  %v3199_v12 = vld [vmem:[#allocation27_spill] sm:$0xff] }
 0x17b   : > { %v910_v10 = vadd.s32 %v878_v18, %v718_v60  ;;  %vm333_vm11 = vcmp.eq.s32.totalorder %v3198_v52, %v2285_v25  ;;  %v342_v30 = vsel %vm310_vm10, 1, %v3189_v62  ;;  %vm464_vm14 = vcmp.eq.s32.totalorder %v3199_v12, %v2285_v25 }
 0x17c   : > { %v365_v18 = vsel %vm333_vm11, 1, %v3189_v62  ;;  %v534_v19 = vadd.s32 %v502_v53, %v342_v30  ;;  %v496_v42 = vsel %vm464_vm14, 1, %v3189_v62  ;;  %vm657_vm7 = vcmp.eq.s32.totalorder %v2253_v58, %v2285_v25 }
 0x17d   : > { %v942_v32 = vcvt.s32.f32 %v910_v10  ;;  %v694_v10 = vsel %vm662_vm12, 1, %v3189_v62  ;;  %vm658_vm14 = vcmp.eq.s32.totalorder %v2304_v33, %v2285_v25 }
 0x17e   : > { %v2523_v36 = vpop.permute.xlu1 %634  ;;  %v726_v21 = vadd.s32 %v694_v10, %v534_v19 }
 0x17f   : > { %1010 = vmatmul.f32.vlgmr.msra.gmra.mxu0 %v942_v32  ;;  %v650_v28 = vpop.permute.xlu0 %649  ;;  %v557_v32 = vadd.s32 %v525_v5, %v365_v18  ;;  %v689_v18 = vsel %vm657_vm7, 1, %v3189_v62 }
 0x180   : > { %vm684_vm0 = vcmp.eq.s32.totalorder %v650_v28, %v2285_v25  ;;  %v2527_v9 = vpop.permute.xlu2 %760 }
 0x181   : > { %v716_v49 = vsel %vm684_vm0, 1, %v3189_v62  ;;  %vm849_vm11 = vcmp.eq.s32.totalorder %v2527_v9, %v2285_v25 }
 0x182   : > { %v2534_v56 = vadd.s32 %v716_v49, %v556_v47  ;;  %v881_v12 = vsel %vm849_vm11, 1, %v3189_v62 }
 0x186   : > { %v644_v6 = vpop.permute.xlu1 %643 }
 0x187   : > { %vm682_vm6 = vcmp.eq.s32.totalorder %v644_v6, %v2285_v25 }
 0x188   : > { %v714_v1 = vsel %vm682_vm6, 1, %v3189_v62  ;;  %v2551_v59 = vpop.permute.xlu2 %766  ;;  %v755_v24 = vpop.permute.xlu0 %754 }
 0x189   : > { %v2555_v37 = vadd.s32 %v714_v1, %v554_v15  ;;  %vm847_vm9 = vcmp.eq.s32.totalorder %v755_v24, %v2285_v25  ;;  %v528_v15 = vadd.s32 %v496_v42, %v336_v3  ;;  %v3203_v1 = vld [vmem:[#allocation12_spill] sm:$0xff]  ;;  %vm851_vm3 = vcmp.eq.s32.totalorder %v2551_v59, %v2285_v25 }
 0x18a   : > { %v879_v0 = vsel %vm847_vm9, 1, %v3189_v62  ;;  %vm305_vm6 = vcmp.eq.s32.totalorder %v3203_v1, %v2285_v25  ;;  %v3210_v59 = vld [vmem:[#allocation36_spill] sm:$0xff] }
 0x18b   : > { %v911_v43 = vadd.s32 %v879_v0, %v719_v40  ;;  %v497_v40 = vsel %vm465_vm5, 1, %v3189_v62  ;;  %v720_v0 = vadd.s32 %v688_v4, %v528_v15  ;;  %v337_v30 = vsel %vm305_vm6, 1, %v3189_v62  ;;  %v3207_v15 = vld [vmem:[#allocation7_spill] sm:$0xff] }
 0x18c   : > { %v529_v19 = vadd.s32 %v497_v40, %v337_v30  ;;  %vm307_vm1 = vcmp.eq.s32.totalorder %v3207_v15, %v2285_v25  ;;  %vm487_vm6 = vcmp.eq.s32.totalorder %v3210_v59, %v2285_v25 }
 0x18d   : > { %v943_v60 = vcvt.s32.f32 %v911_v43  ;;  %v742_v43 = vadd.s32 %v710_v39, %v550_v63  ;;  %v339_v63 = vsel %vm307_vm1, 1, %v3189_v62 }
 0x18e   : > { %v653_v14 = vpop.permute.xlu1 %652 }
 0x18f   : > { %vm685_vm13 = vcmp.eq.s32.totalorder %v653_v14, %v2285_v25  ;;  %1013 = vmatmul.f32.gmra.mxu0 %v943_v60 }
 0x190   : > { %v717_v50 = vsel %vm685_vm13, 1, %v3189_v62  ;;  %v776_v28 = vpop.permute.xlu2 %775  ;;  %v2574_v47 = vpop.permute.xlu0 %769 }
 0x191   : > { %v2578_v49 = vadd.s32 %v717_v50, %v557_v32  ;;  %vm854_vm0 = vcmp.eq.s32.totalorder %v776_v28, %v2285_v25  ;;  %v3204_v28 = vld [vmem:[#allocation30_spill] sm:$0xff]  ;;  %vm852_vm11 = vcmp.eq.s32.totalorder %v2574_v47, %v2285_v25 }
 0x192   : > { %v886_v38 = vsel %vm854_vm0, 1, %v3189_v62  ;;  %vm466_vm12 = vcmp.eq.s32.totalorder %v3204_v28, %v2285_v25 }
 0x193   : > { %v918_v45 = vadd.s32 %v886_v38, %v726_v21  ;;  %v721_v21 = vadd.s32 %v689_v18, %v529_v19  ;;  %v3205_v38 = vld [vmem:[#allocation6_spill] sm:$0xff]  ;;  %v498_v22 = vsel %vm466_vm12, 1, %v3189_v62 }
 0x194   : > { %vm306_vm13 = vcmp.eq.s32.totalorder %v3205_v38, %v2285_v25  ;;  %v3212_v18 = vld [vmem:[#allocation18_spill] sm:$0xff]  ;;  %v884_v38 = vsel %vm852_vm11, 1, %v3189_v62 }
 0x195   : > { %v950_v6 = vcvt.s32.f32 %v918_v45  ;;  %v338_v42 = vsel %vm306_vm13, 1, %v3189_v62  ;;  %v690_v45 = vsel %vm658_vm14, 1, %v3189_v62 }
 0x196   : > { %v530_v61 = vadd.s32 %v498_v22, %v338_v42 }
 0x197   : > { %1034 = vmatmul.f32.vlgmr.msra.gmra.mxu1 %v950_v6  ;;  %v758_v24 = vpop.permute.xlu1 %757  ;;  %v3206_v6 = vld [vmem:[#allocation23_spill] sm:$0xff] }
 0x198   : > { %vm848_vm8 = vcmp.eq.s32.totalorder %v758_v24, %v2285_v25  ;;  %v824_v44 = vpop.permute.xlu2 %823  ;;  %v779_v52 = vpop.permute.xlu0 %778  ;;  %vm467_vm0 = vcmp.eq.s32.totalorder %v3206_v6, %v2285_v25  ;;  %v722_v26 = vadd.s32 %v690_v45, %v530_v61  ;;  %v691_v24 = vsel %vm659_vm2, 1, %v3189_v62  ;;  %v3215_v45 = vld [vmem:[#allocation34_spill] sm:$0xff] }
 0x199   : > { %v880_v53 = vsel %vm848_vm8, 1, %v3189_v62  ;;  %vm870_vm9 = vcmp.eq.s32.totalorder %v824_v44, %v2285_v25  ;;  %vm855_vm10 = vcmp.eq.s32.totalorder %v779_v52, %v2285_v25  ;;  %v499_v1 = vsel %vm467_vm0, 1, %v3189_v62  ;;  %v3208_v52 = vld [vmem:[#allocation32_spill] sm:$0xff] }
 0x19a   : > { %v902_v5 = vsel %vm870_vm9, 1, %v3189_v62  ;;  %v887_v60 = vsel %vm855_vm10, 1, %v3189_v62  ;;  %v912_v58 = vadd.s32 %v880_v53, %v720_v0  ;;  %v531_v40 = vadd.s32 %v499_v1, %v339_v63  ;;  %v3216_v63 = vld [vmem:[#allocation16_spill] sm:$0xff] }
 0x19b   : > { %v919_v10 = vadd.s32 %v887_v60, %v2321_v29  ;;  %v934_v14 = vadd.s32 %v902_v5, %v742_v43  ;;  %v913_v29 = vadd.s32 %v881_v12, %v721_v21  ;;  %v883_v44 = vsel %vm851_vm3, 1, %v3189_v62  ;;  %v3209_v5 = vld [vmem:[#allocation15_spill] sm:$0xff] }
 0x19c   : > { %v944_v32 = vcvt.s32.f32 %v912_v58  ;;  %vm468_vm4 = vcmp.eq.s32.totalorder %v3208_v52, %v2285_v25  ;;  %v723_v43 = vadd.s32 %v691_v24, %v531_v40  ;;  %vm308_vm5 = vcmp.eq.s32.totalorder %v3209_v5, %v2285_v25  ;;  %v3211_v58 = vld [vmem:[#allocation38_spill] sm:$0xff] }
 0x19d   : > { %v951_v9 = vcvt.s32.f32 %v919_v10  ;;  %v966_v50 = vcvt.s32.f32 %v934_v14  ;;  %v945_v46 = vcvt.s32.f32 %v913_v29  ;;  %vm660_vm7 = vcmp.eq.s32.totalorder %v3211_v58, %v2285_v25  ;;  %v3214_v29 = vld [vmem:[#allocation33_spill] sm:$0xff] }
 0x19e   : > { %1016 = vmatmul.f32.gmra.mxu0 %v944_v32  ;;  %v915_v30 = vadd.s32 %v883_v44, %v723_v43  ;;  %vm327_vm9 = vcmp.eq.s32.totalorder %v3212_v18, %v2285_v25  ;;  %v500_v10 = vsel %vm468_vm4, 1, %v3189_v62  ;;  %vm679_vm10 = vcmp.eq.s32.totalorder %v2523_v36, %v2285_v25 }
 0x19f   : > { %1037 = vmatmul.f32.gmra.mxu1 %v951_v9  ;;  %1082 = vmatmul.f32.vlgmr.msra.gmra.mxu3 %v966_v50  ;;  %v764_v55 = vpop.permute.xlu1 %763  ;;  %v340_v32 = vsel %vm308_vm5, 1, %v3189_v62  ;;  %v519_v12 = vsel %vm487_vm6, 1, %v3189_v62  ;;  %v692_v9 = vsel %vm660_vm7, 1, %v3189_v62  ;;  %v3213_v50 = vld [vmem:[#allocation14_spill] sm:$0xff]  ;;  %v359_v36 = vsel %vm327_vm9, 1, %v3189_v62 }
 0x1a0   : > { %vm850_vm15 = vcmp.eq.s32.totalorder %v764_v55, %v2285_v25  ;;  %v803_v3 = vpop.permute.xlu0 %802  ;;  %v806_v53 = vpop.permute.xlu2 %805  ;;  %vm309_vm13 = vcmp.eq.s32.totalorder %v3213_v50, %v2285_v25  ;;  %v532_v28 = vadd.s32 %v500_v10, %v340_v32  ;;  %v947_v21 = vcvt.s32.f32 %v915_v30  ;;  %v3218_v32 = vld [vmem:[#allocation9_spill] sm:$0xff] }
 0x1a1   : > { %v882_v4 = vsel %vm850_vm15, 1, %v3189_v62  ;;  %vm863_vm12 = vcmp.eq.s32.totalorder %v803_v3, %v2285_v25  ;;  %v711_v47 = vsel %vm679_vm10, 1, %v3189_v62  ;;  %vm469_vm14 = vcmp.eq.s32.totalorder %v3214_v29, %v2285_v25 }
 0x1a2   : > { %v914_v39 = vadd.s32 %v882_v4, %v722_v26  ;;  %v551_v22 = vadd.s32 %v519_v12, %v359_v36  ;;  %v724_v42 = vadd.s32 %v692_v9, %v532_v28  ;;  %vm472_vm15 = vcmp.eq.s32.totalorder %v3215_v45, %v2285_v25  ;;  %v3219_v12 = vld [vmem:[#allocation37_spill] sm:$0xff] }
 0x1a3   : > { %vm661_vm0 = vcmp.eq.s32.totalorder %v2339_v51, %v2285_v25  ;;  %v341_v15 = vsel %vm309_vm13, 1, %v3189_v62  ;;  %vm312_vm2 = vcmp.eq.s32.totalorder %v3216_v63, %v2285_v25  ;;  %vm664_vm3 = vcmp.eq.s32.totalorder %v2379_v54, %v2285_v25 }
 0x1a4   : > { %v946_v0 = vcvt.s32.f32 %v914_v39  ;;  %v743_v3 = vadd.s32 %v711_v47, %v551_v22  ;;  %v916_v6 = vadd.s32 %v884_v38, %v724_v42  ;;  %v501_v39 = vsel %vm469_vm14, 1, %v3189_v62 }
 0x1a5   : > { %v693_v40 = vsel %vm661_vm0, 1, %v3189_v62  ;;  %vm864_vm5 = vcmp.eq.s32.totalorder %v806_v53, %v2285_v25  ;;  %v696_v43 = vsel %vm664_vm3, 1, %v3189_v62  ;;  %vm313_vm9 = vcmp.eq.s32.totalorder %v3218_v32, %v2285_v25 }
 0x1a6   : > { %1019 = vmatmul.f32.gmra.mxu0 %v945_v46  ;;  %v948_v54 = vcvt.s32.f32 %v916_v6  ;;  %v896_v58 = vsel %vm864_vm5, 1, %v3189_v62  ;;  %vm665_vm10 = vcmp.eq.s32.totalorder %v3219_v12, %v2285_v25  ;;  %vm667_vm3 = vcmp.eq.s32.totalorder %v2419_v57, %v2285_v25 }
 0x1a7   : > { %v2631_v33 = vpop.permute.xlu1 %772 }
 0x1a8   : > { %v830_v2 = vpop.permute.xlu0 %829  ;;  %v809_v46 = vpop.permute.xlu2 %808  ;;  %vm853_vm4 = vcmp.eq.s32.totalorder %v2631_v33, %v2285_v25  ;;  %v344_v33 = vsel %vm312_vm2, 1, %v3189_v62 }
 0x1a9   : > { %vm872_vm6 = vcmp.eq.s32.totalorder %v830_v2, %v2285_v25  ;;  %v885_v5 = vsel %vm853_vm4, 1, %v3189_v62  ;;  %v3217_v2 = vld [vmem:[#allocation28_spill] sm:$0xff]  ;;  %vm865_vm11 = vcmp.eq.s32.totalorder %v809_v46, %v2285_v25 }
 0x1aa   : > { %v904_v51 = vsel %vm872_vm6, 1, %v3189_v62  ;;  %vm473_vm7 = vcmp.eq.s32.totalorder %v3217_v2, %v2285_v25  ;;  %v897_v29 = vsel %vm865_vm11, 1, %v3189_v62 }
 0x1ae   : > { %1022 = vmatmul.f32.gmra.mxu0 %v946_v0  ;;  %v533_v0 = vadd.s32 %v501_v39, %v341_v15 }
 0x1af   : > { %v800_v60 = vpop.permute.xlu1 %799 }
 0x1b0   : > { %vm862_vm8 = vcmp.eq.s32.totalorder %v800_v60, %v2285_v25  ;;  %v833_v4 = vpop.permute.xlu0 %832  ;;  %v725_v59 = vadd.s32 %v693_v40, %v533_v0  ;;  %v812_v9 = vpop.permute.xlu2 %811 }
 0x1b1   : > { %v894_v14 = vsel %vm862_vm8, 1, %v3189_v62  ;;  %vm866_vm14 = vcmp.eq.s32.totalorder %v812_v9, %v2285_v25 }
 0x1b2   : > { %v926_v19 = vadd.s32 %v894_v14, %v2456_v23  ;;  %v895_v23 = vsel %vm863_vm12, 1, %v3189_v62  ;;  %v917_v18 = vadd.s32 %v885_v5, %v725_v59  ;;  %v928_v14 = vadd.s32 %v896_v58, %v2434_v34 }
 0x1b3   : > { %v927_v26 = vadd.s32 %v895_v23, %v2356_v41  ;;  %v504_v41 = vsel %vm472_vm15, 1, %v3189_v62  ;;  %vm873_vm12 = vcmp.eq.s32.totalorder %v833_v4, %v2285_v25  ;;  %v345_v34 = vsel %vm313_vm9, 1, %v3189_v62 }
 0x1b4   : > { %v958_v55 = vcvt.s32.f32 %v926_v19  ;;  %v536_v60 = vadd.s32 %v504_v41, %v344_v33  ;;  %v936_v19 = vadd.s32 %v904_v51, %v2462_v17  ;;  %v697_v17 = vsel %vm665_vm10, 1, %v3189_v62 }
 0x1b5   : > { %v959_v44 = vcvt.s32.f32 %v927_v26  ;;  %v960_v47 = vcvt.s32.f32 %v928_v14  ;;  %v905_v22 = vsel %vm873_vm12, 1, %v3189_v62  ;;  %v898_v63 = vsel %vm866_vm14, 1, %v3189_v62  ;;  %v3223_v14 = vld [vmem:[#allocation11_spill] sm:$0xff] }
 0x1b6   : > { %1025 = vmatmul.f32.gmra.mxu0 %v947_v21  ;;  %1058 = vmatmul.f32.vlgmr.msra.gmra.mxu2 %v958_v55  ;;  %v728_v30 = vadd.s32 %v696_v43, %v536_v60  ;;  %v505_v21 = vsel %vm473_vm7, 1, %v3189_v62  ;;  %v949_v55 = vcvt.s32.f32 %v917_v18  ;;  %v968_v38 = vcvt.s32.f32 %v936_v19 }
 0x1b7   : > { %v827_v61 = vpop.permute.xlu1 %826  ;;  %v537_v23 = vadd.s32 %v505_v21, %v345_v34  ;;  %v937_v46 = vadd.s32 %v905_v22, %v2517_v7  ;;  %v3220_v7 = vld [vmem:[#allocation35_spill] sm:$0xff]  ;;  %v930_v40 = vadd.s32 %v898_v63, %v2396_v11  ;;  %v699_v11 = vsel %vm667_vm3, 1, %v3189_v62 }
 0x1b8   : > { %vm871_vm1 = vcmp.eq.s32.totalorder %v827_v61, %v2285_v25  ;;  %v836_v50 = vpop.permute.xlu0 %835  ;;  %v815_v6 = vpop.permute.xlu2 %814  ;;  %vm475_vm0 = vcmp.eq.s32.totalorder %v3220_v7, %v2285_v25  ;;  %vm668_vm9 = vcmp.eq.s32.totalorder %v2307_v48, %v2285_v25 }
 0x1b9   : > { %v903_v1 = vsel %vm871_vm1, 1, %v3189_v62  ;;  %v729_v45 = vadd.s32 %v697_v17, %v537_v23  ;;  %vm874_vm15 = vcmp.eq.s32.totalorder %v836_v50, %v2285_v25  ;;  %vm867_vm4 = vcmp.eq.s32.totalorder %v815_v6, %v2285_v25 }
 0x1ba   : > { %v935_v24 = vadd.s32 %v903_v1, %v743_v3  ;;  %v929_v3 = vadd.s32 %v897_v29, %v2485_v13  ;;  %v969_v1 = vcvt.s32.f32 %v937_v46  ;;  %v899_v59 = vsel %vm867_vm4, 1, %v3189_v62 }
 0x1bb   : > { %v931_v18 = vadd.s32 %v899_v59, %v2464_v16  ;;  %v700_v16 = vsel %vm668_vm9, 1, %v3189_v62 }
 0x1bc   : > { %v967_v52 = vcvt.s32.f32 %v935_v24  ;;  %v961_v39 = vcvt.s32.f32 %v929_v3  ;;  %v906_v24 = vsel %vm874_vm15, 1, %v3189_v62 }
 0x1bd   : > { %v938_v0 = vadd.s32 %v906_v24, %v2555_v37  ;;  %v962_v37 = vcvt.s32.f32 %v930_v40  ;;  %v963_v50 = vcvt.s32.f32 %v931_v18 }
 0x1be   : > { %1028 = vmatmul.f32.gmra.mxu0 %v948_v54  ;;  %1061 = vmatmul.f32.gmra.mxu2 %v959_v44  ;;  %v3221_v54 = vld [vmem:[#allocation17_spill] sm:$0xff] }
 0x1bf   : > { %1085 = vmatmul.f32.gmra.mxu3 %v967_v52  ;;  %v782_v53 = vpop.permute.xlu1 %781  ;;  %vm315_vm2 = vcmp.eq.s32.totalorder %v3221_v54, %v2285_v25  ;;  %v507_v52 = vsel %vm475_vm0, 1, %v3189_v62  ;;  %v970_v5 = vcvt.s32.f32 %v938_v0 }
 0x1c0   : > { %vm856_vm8 = vcmp.eq.s32.totalorder %v782_v53, %v2285_v25  ;;  %v839_v26 = vpop.permute.xlu0 %838  ;;  %v347_v43 = vsel %vm315_vm2, 1, %v3189_v62  ;;  %v818_v58 = vpop.permute.xlu2 %817  ;;  %v3222_v53 = vld [vmem:[#allocation31_spill] sm:$0xff] }
 0x1c1   : > { %v888_v10 = vsel %vm856_vm8, 1, %v3189_v62  ;;  %vm875_vm5 = vcmp.eq.s32.totalorder %v839_v26, %v2285_v25  ;;  %v539_v60 = vadd.s32 %v507_v52, %v347_v43  ;;  %vm476_vm6 = vcmp.eq.s32.totalorder %v3222_v53, %v2285_v25 }
 0x1c2   : > { %v920_v28 = vadd.s32 %v888_v10, %v728_v30  ;;  %v907_v57 = vsel %vm875_vm5, 1, %v3189_v62  ;;  %vm316_vm8 = vcmp.eq.s32.totalorder %v3223_v14, %v2285_v25  ;;  %v508_v32 = vsel %vm476_vm6, 1, %v3189_v62 }
 0x1c3   : > { %v731_v2 = vadd.s32 %v699_v11, %v539_v60  ;;  %v939_v10 = vadd.s32 %v907_v57, %v2490_v8  ;;  %vm868_vm10 = vcmp.eq.s32.totalorder %v818_v58, %v2285_v25  ;;  %v348_v9 = vsel %vm316_vm8, 1, %v3189_v62 }
 0x1c4   : > { %v952_v36 = vcvt.s32.f32 %v920_v28  ;;  %v540_v28 = vadd.s32 %v508_v32, %v348_v9  ;;  %v900_v21 = vsel %vm868_vm10, 1, %v3189_v62 }
 0x1c5   : > { %v971_v8 = vcvt.s32.f32 %v939_v10 }
 0x1c6   : > { %1031 = vmatmul.f32.gmra.mxu0 %v949_v55  ;;  %1040 = vmatmul.f32.gmra.mxu1 %v952_v36  ;;  %v732_v36 = vadd.s32 %v700_v16, %v540_v28 }
 0x1c7   : > { %1064 = vmatmul.f32.gmra.mxu2 %v960_v47  ;;  %1088 = vmatmul.f32.gmra.mxu3 %v968_v38  ;;  %v785_v42 = vpop.permute.xlu1 %784  ;;  %v932_v38 = vadd.s32 %v900_v21, %v2511_v27 }
 0x1c8   : > { %vm857_vm13 = vcmp.eq.s32.totalorder %v785_v42, %v2285_v25  ;;  %v821_v34 = vpop.permute.xlu2 %820 }
 0x1c9   : > { %v889_v61 = vsel %vm857_vm13, 1, %v3189_v62  ;;  %vm869_vm13 = vcmp.eq.s32.totalorder %v821_v34, %v2285_v25  ;;  %v964_v42 = vcvt.s32.f32 %v932_v38 }
 0x1ca   : > { %v921_v4 = vadd.s32 %v889_v61, %v729_v45  ;;  %v901_v61 = vsel %vm869_vm13, 1, %v3189_v62 }
 0x1cc   : > { %v953_v15 = vcvt.s32.f32 %v921_v4 }
 0x1ce   : > { %1043 = vmatmul.f32.gmra.mxu1 %v953_v15 }
 0x1cf   : > { %1067 = vmatmul.f32.gmra.mxu2 %v961_v39  ;;  %1091 = vmatmul.f32.gmra.mxu3 %v969_v1  ;;  %v788_v13 = vpop.permute.xlu1 %787  ;;  %v2782_v1 = vld [vmem:[%s3145_s2] ss:$0 sm:$0xff] }
 0x1d0   : > { %vm858_vm1 = vcmp.eq.s32.totalorder %v788_v13, %v2285_v25 }
 0x1d1   : > { %v890_v41 = vsel %vm858_vm1, 1, %v3189_v62 }
 0x1d2   : > { %v922_v44 = vadd.s32 %v890_v41, %v2358_v35  ;;  %v842_v35 = vpop.permute.xlu0 %841 }
 0x1d3   : > { %vm876_vm11 = vcmp.eq.s32.totalorder %v842_v35, %v2285_v25 }
 0x1d4   : > { %v954_v33 = vcvt.s32.f32 %v922_v44  ;;  %v908_v55 = vsel %vm876_vm11, 1, %v3189_v62 }
 0x1d5   : > { %v940_v23 = vadd.s32 %v908_v55, %v2534_v56  ;;  %v933_v56 = vadd.s32 %v901_v61, %v2432_v31 }
 0x1d6   : > { %1046 = vmatmul.f32.gmra.mxu1 %v954_v33 }
 0x1d7   : > { %1070 = vmatmul.f32.gmra.mxu2 %v962_v37  ;;  %1094 = vmatmul.f32.gmra.mxu3 %v970_v5  ;;  %v791_v51 = vpop.permute.xlu1 %790  ;;  %v972_v45 = vcvt.s32.f32 %v940_v23  ;;  %v965_v15 = vcvt.s32.f32 %v933_v56 }
 0x1d8   : > { %vm859_vm7 = vcmp.eq.s32.totalorder %v791_v51, %v2285_v25 }
 0x1d9   : > { %v891_v30 = vsel %vm859_vm7, 1, %v3189_v62 }
 0x1da   : > { %v923_v19 = vadd.s32 %v891_v30, %v731_v2  ;;  %v845_v17 = vpop.permute.xlu0 %844 }
 0x1db   : > { %vm877_vm14 = vcmp.eq.s32.totalorder %v845_v17, %v2285_v25 }
 0x1dc   : > { %v955_v12 = vcvt.s32.f32 %v923_v19  ;;  %v909_v3 = vsel %vm877_vm14, 1, %v3189_v62 }
 0x1dd   : > { %v941_v4 = vadd.s32 %v909_v3, %v2578_v49 }
 0x1de   : > { %1049 = vmatmul.f32.gmra.mxu1 %v955_v12 }
 0x1df   : > { %1073 = vmatmul.f32.gmra.mxu2 %v963_v50  ;;  %1097 = vmatmul.f32.gmra.mxu3 %v971_v8  ;;  %v794_v48 = vpop.permute.xlu1 %793  ;;  %v973_v39 = vcvt.s32.f32 %v941_v4 }
 0x1e0   : > { %vm860_vm12 = vcmp.eq.s32.totalorder %v794_v48, %v2285_v25 }
 0x1e1   : > { %v892_v47 = vsel %vm860_vm12, 1, %v3189_v62 }
 0x1e2   : > { %v924_v29 = vadd.s32 %v892_v47, %v732_v36 }
 0x1e4   : > { %v956_v22 = vcvt.s32.f32 %v924_v29 }
 0x1e6   : > { %1052 = vmatmul.f32.gmra.mxu1 %v956_v22 }
 0x1e7   : > { %1076 = vmatmul.f32.gmra.mxu2 %v964_v42  ;;  %1100 = vmatmul.f32.gmra.mxu3 %v972_v45  ;;  %v797_v46 = vpop.permute.xlu1 %796 }
 0x1e8   : > { %vm861_vm15 = vcmp.eq.s32.totalorder %v797_v46, %v2285_v25 }
 0x1e9   : > { %v893_v27 = vsel %vm861_vm15, 1, %v3189_v62 }
 0x1ea   : > { %v925_v6 = vadd.s32 %v893_v27, %v2398_v20 }
 0x1ec   : > { %v957_v26 = vcvt.s32.f32 %v925_v6 }
 0x1ee   : > { %1055 = vmatmul.f32.gmra.mxu1 %v957_v26 }
 0x1ef   : > { %1079 = vmatmul.f32.gmra.mxu2 %v965_v15  ;;  %1103 = vmatmul.f32.gmra.mxu3 %v973_v39 }
 0x1fc   : > { %v1011_v25 = vpop.f32.mrf.mxu0 }
 0x1fd   : > { %v2785_v62 = vadd.f32 %v2782_v1, %v1011_v25 }
 0x1ff   : > { %1107 = vmax.xlane.f32.xlu2 %v2785_v62 }
 0x20c   : > { %v1014_v31 = vpop.f32.mrf.mxu0 }
 0x20d   : > { %v2789_v20 = vadd.f32 %v2782_v1, %v1014_v31 }
 0x20f   : > { %1109 = vmax.xlane.f32.xlu0 %v2789_v20 }
 0x214   : > { %v1035_v40 = vpop.f32.mrf.mxu1 }
 0x215   : > { %v2809_v43 = vadd.f32 %v2782_v1, %v1035_v40 }
 0x21b   : > { %v1017_v49 = vpop.f32.mrf.mxu0 }
 0x21c   : > { %v2793_v63 = vadd.f32 %v2782_v1, %v1017_v49  ;;  %v1038_v52 = vpop.f32.mrf.mxu1 }
 0x21d   : > { %v2817_v59 = vadd.f32 %v2782_v1, %v1038_v52 }
 0x21e   : > { %1111 = vmax.xlane.f32.xlu1 %v2793_v63 }
 0x222   : > { %v1083_v57 = vpop.f32.mrf.mxu3 }
 0x223   : > { %v1020_v24 = vpop.f32.mrf.mxu0  ;;  %v2885_v27 = vadd.f32 %v2782_v1, %v1083_v57 }
 0x224   : > { %v2797_v13 = vadd.f32 %v2782_v1, %v1020_v24 }
 0x226   : > { %1113 = vmax.xlane.f32.xlu2 %v2797_v13 }
 0x22b   : > { %v1023_v7 = vpop.f32.mrf.mxu0 }
 0x22c   : > { %v2801_v41 = vadd.f32 %v2782_v1, %v1023_v7 }
 0x22e   : > { %1115 = vmax.xlane.f32.xlu2 %v2801_v41 }
 0x233   : > { %v1026_v0 = vpop.f32.mrf.mxu0 }
 0x234   : > { %v2805_v54 = vadd.f32 %v2782_v1, %v1026_v0 }
 0x236   : > { %1117 = vmax.xlane.f32.xlu0 %v2805_v54 }
 0x239   : > { %v1059_v44 = vpop.f32.mrf.mxu2 }
 0x23a   : > { %v2841_v8 = vadd.f32 %v2782_v1, %v1059_v44 }
 0x23b   : > { %v1029_v33 = vpop.f32.mrf.mxu0 }
 0x23c   : > { %v2812_v11 = vadd.f32 %v2782_v1, %v1029_v33 }
 0x23e   : > { %1123 = vmax.xlane.f32.xlu0 %v2809_v43  ;;  %1119 = vmax.xlane.f32.xlu1 %v2812_v11 }
 0x241   : > { %v1062_v37 = vpop.f32.mrf.mxu2 }
 0x242   : > { %v1086_v30 = vpop.f32.mrf.mxu3  ;;  %v2855_v17 = vadd.f32 %v2782_v1, %v1062_v37 }
 0x243   : > { %v1032_v5 = vpop.f32.mrf.mxu0  ;;  %v1041_v60 = vpop.f32.mrf.mxu1  ;;  %v2873_v45 = vadd.f32 %v2782_v1, %v1086_v30 }
 0x244   : > { %v2820_v58 = vadd.f32 %v2782_v1, %v1032_v5  ;;  %v2825_v53 = vadd.f32 %v2782_v1, %v1041_v60 }
 0x246   : > { %1121 = vmax.xlane.f32.xlu2 %v2820_v58  ;;  %1125 = vmax.xlane.f32.xlu1 %v2817_v59 }
 0x24a   : > { %v1065_v35 = vpop.f32.mrf.mxu2  ;;  %v1089_v19 = vpop.f32.mrf.mxu3 }
 0x24b   : > { %v1044_v51 = vpop.f32.mrf.mxu1  ;;  %v2861_v38 = vadd.f32 %v2782_v1, %v1065_v35  ;;  %v2891_v4 = vadd.f32 %v2782_v1, %v1089_v19 }
 0x24c   : > { %v2828_v2 = vadd.f32 %v2782_v1, %v1044_v51 }
 0x24e   : > { %1129 = vmax.xlane.f32.xlu0 %v2828_v2  ;;  %1127 = vmax.xlane.f32.xlu2 %v2825_v53 }
 0x252   : > { %v1068_v18 = vpop.f32.mrf.mxu2  ;;  %v1092_v16 = vpop.f32.mrf.mxu3 }
 0x253   : > { %v1047_v10 = vpop.f32.mrf.mxu1  ;;  %v2849_v36 = vadd.f32 %v2782_v1, %v1068_v18  ;;  %v2900_v39 = vadd.f32 %v2782_v1, %v1092_v16 }
 0x254   : > { %v2833_v14 = vadd.f32 %v2782_v1, %v1047_v10 }
 0x256   : > { %1131 = vmax.xlane.f32.xlu1 %v2833_v14 }
 0x25a   : > { %v1071_v12 = vpop.f32.mrf.mxu2  ;;  %v1095_v55 = vpop.f32.mrf.mxu3 }
 0x25b   : > { %v1050_v32 = vpop.f32.mrf.mxu1  ;;  %v2867_v29 = vadd.f32 %v2782_v1, %v1071_v12  ;;  %v2888_v56 = vadd.f32 %v2782_v1, %v1095_v55 }
 0x25c   : > { %v2837_v9 = vadd.f32 %v2782_v1, %v1050_v32 }
 0x25e   : > { %1133 = vmax.xlane.f32.xlu2 %v2837_v9 }
 0x262   : > { %v1074_v21 = vpop.f32.mrf.mxu2  ;;  %v1098_v22 = vpop.f32.mrf.mxu3 }
 0x263   : > { %v1053_v50 = vpop.f32.mrf.mxu1  ;;  %v2876_v61 = vadd.f32 %v2782_v1, %v1074_v21  ;;  %v2907_v24 = vadd.f32 %v2782_v1, %v1098_v22 }
 0x264   : > { %v2844_v28 = vadd.f32 %v2782_v1, %v1053_v50 }
 0x266   : > { %1135 = vmax.xlane.f32.xlu0 %v2844_v28  ;;  %1139 = vmax.xlane.f32.xlu2 %v2841_v8 }
 0x26a   : > { %v1077_v47 = vpop.f32.mrf.mxu2  ;;  %v1101_v46 = vpop.f32.mrf.mxu3 }
 0x26b   : > { %v1056_v48 = vpop.f32.mrf.mxu1  ;;  %v2864_v23 = vadd.f32 %v2782_v1, %v1077_v47  ;;  %v2920_v44 = vadd.f32 %v2782_v1, %v1101_v46 }
 0x26c   : > { %v2852_v34 = vadd.f32 %v2782_v1, %v1056_v48 }
 0x26e   : > { %1137 = vmax.xlane.f32.xlu1 %v2852_v34  ;;  %1145 = vmax.xlane.f32.xlu2 %v2849_v36 }
 0x26f   : > { %1141 = vmax.xlane.f32.xlu0 %v2855_v17 }
 0x272   : > { %v1080_v42 = vpop.f32.mrf.mxu2  ;;  %v1108_v6 = vpop.xlane.xlu2 %1107 }
 0x273   : > { %v2879_v3 = vadd.f32 %v2782_v1, %v1080_v42  ;;  %v2897_v26 = vsub.f32 %v2785_v62, %v1108_v6  ;;  %v1104_v15 = vpop.f32.mrf.mxu3 }
 0x274   : > { %v2904_v31 = vadd.f32 %v2782_v1, %v1104_v15 }
 0x275   : > { %v1203_v25 = vmul.f32 1.442695, %v2897_v26 }
 0x276   : > { %1151 = vmax.xlane.f32.xlu2 %v2864_v23  ;;  %1143 = vmax.xlane.f32.xlu1 %v2861_v38 }
 0x277   : > { %1147 = vmax.xlane.f32.xlu0 %v2867_v29  ;;  %1656 = vpow2.f32 %v1203_v25 }
 0x27d   : > { %v1657_v33 = vpop.eup %1656 }
 0x27e   : > { %1157 = vmax.xlane.f32.xlu2 %v2873_v45  ;;  %1149 = vmax.xlane.f32.xlu1 %v2876_v61 }
 0x27f   : > { %1153 = vmax.xlane.f32.xlu0 %v2879_v3 }
 0x282   : > { %v1110_v49 = vpop.xlane.xlu0 %1109 }
 0x283   : > { %v2912_v62 = vsub.f32 %v2789_v20, %v1110_v49 }
 0x285   : > { %v1205_v0 = vmul.f32 1.442695, %v2912_v62 }
 0x286   : > { %1155 = vmax.xlane.f32.xlu1 %v2885_v27  ;;  %1163 = vmax.xlane.f32.xlu2 %v2888_v56 }
 0x287   : > { %1159 = vmax.xlane.f32.xlu0 %v2891_v4 }
 0x28e   : > { %1161 = vmax.xlane.f32.xlu1 %v2900_v39  ;;  %1169 = vmax.xlane.f32.xlu2 %v2904_v31 }
 0x28f   : > { %1165 = vmax.xlane.f32.xlu0 %v2907_v24 }
 0x291   : > { %v1112_v7 = vpop.xlane.xlu1 %1111 }
 0x292   : > { %v2916_v40 = vsub.f32 %v2793_v63, %v1112_v7 }
 0x294   : > { %v1207_v52 = vmul.f32 1.442695, %v2916_v40 }
 0x296   : > { %1658 = vpow2.f32 %v1207_v52  ;;  %1167 = vmax.xlane.f32.xlu1 %v2920_v44 }
 0x297   : > { %1660 = vpow2.f32 %v1205_v0  ;;  %1267 = vadd.xlane.f32.xlu0 %v1657_v33 }
 0x299   : > { %v1114_v20 = vpop.xlane.xlu2 %1113 }
 0x29a   : > { %v2925_v37 = vsub.f32 %v2797_v13, %v1114_v20 }
 0x29c   : > { %v1659_v5 = vpop.eup %1658  ;;  %v1209_v63 = vmul.f32 1.442695, %v2925_v37 }
 0x29d   : > { %v1661_v60 = vpop.eup %1660  ;;  %1271 = vadd.xlane.f32.xlu2 %v1659_v5 }
 0x29e   : > { %1662 = vpow2.f32 %v1209_v63  ;;  %1269 = vadd.xlane.f32.xlu1 %v1661_v60 }
 0x2a1   : > { %v1116_v1 = vpop.xlane.xlu2 %1115 }
 0x2a2   : > { %v2929_v57 = vsub.f32 %v2801_v41, %v1116_v1 }
 0x2a4   : > { %v1663_v35 = vpop.eup %1662  ;;  %v1211_v51 = vmul.f32 1.442695, %v2929_v57 }
 0x2a5   : > { %1273 = vadd.xlane.f32.xlu0 %v1663_v35 }
 0x2a6   : > { %1664 = vpow2.f32 %v1211_v51 }
 0x2a9   : > { %v1118_v30 = vpop.xlane.xlu0 %1117 }
 0x2aa   : > { %v2933_v13 = vsub.f32 %v2805_v54, %v1118_v30 }
 0x2ac   : > { %v1665_v18 = vpop.eup %1664  ;;  %v1213_v10 = vmul.f32 1.442695, %v2933_v13 }
 0x2ad   : > { %1275 = vadd.xlane.f32.xlu1 %v1665_v18 }
 0x2ae   : > { %1666 = vpow2.f32 %v1213_v10 }
 0x2b1   : > { %v1120_v19 = vpop.xlane.xlu1 %1119  ;;  %v1124_v32 = vpop.xlane.xlu0 %1123 }
 0x2b2   : > { %v2937_v12 = vsub.f32 %v2812_v11, %v1120_v19  ;;  %v2940_v41 = vsub.f32 %v2809_v43, %v1124_v32 }
 0x2b4   : > { %v1667_v16 = vpop.eup %1666  ;;  %v1215_v50 = vmul.f32 1.442695, %v2937_v12  ;;  %v1219_v21 = vmul.f32 1.442695, %v2940_v41 }
 0x2b5   : > { %1277 = vadd.xlane.f32.xlu2 %v1667_v16 }
 0x2b6   : > { %1668 = vpow2.f32 %v1215_v50 }
 0x2b7   : > { %1670 = vpow2.f32 %v1219_v21 }
 0x2b9   : > { %v1122_v54 = vpop.xlane.xlu2 %1121  ;;  %v1126_v55 = vpop.xlane.xlu1 %1125 }
 0x2ba   : > { %v2945_v48 = vsub.f32 %v2820_v58, %v1122_v54  ;;  %v2948_v47 = vsub.f32 %v2817_v59, %v1126_v55 }
 0x2bc   : > { %v1669_v11 = vpop.eup %1668  ;;  %v1217_v43 = vmul.f32 1.442695, %v2945_v48  ;;  %v1221_v22 = vmul.f32 1.442695, %v2948_v47 }
 0x2bd   : > { %v1671_v42 = vpop.eup %1670  ;;  %1279 = vadd.xlane.f32.xlu0 %v1669_v11 }
 0x2be   : > { %1672 = vpow2.f32 %v1217_v43  ;;  %1283 = vadd.xlane.f32.xlu2 %v1671_v42 }
 0x2bf   : > { %1674 = vpow2.f32 %v1221_v22 }
 0x2c1   : > { %v1128_v46 = vpop.xlane.xlu2 %1127  ;;  %v1130_v6 = vpop.xlane.xlu0 %1129 }
 0x2c2   : > { %v2953_v15 = vsub.f32 %v2825_v53, %v1128_v46  ;;  %v2956_v58 = vsub.f32 %v2828_v2, %v1130_v6 }
 0x2c4   : > { %v1673_v59 = vpop.eup %1672  ;;  %v1223_v25 = vmul.f32 1.442695, %v2953_v15  ;;  %v1225_v49 = vmul.f32 1.442695, %v2956_v58 }
 0x2c5   : > { %v1675_v7 = vpop.eup %1674  ;;  %1281 = vadd.xlane.f32.xlu1 %v1673_v59 }
 0x2c6   : > { %1676 = vpow2.f32 %v1223_v25  ;;  %1285 = vadd.xlane.f32.xlu0 %v1675_v7 }
 0x2c7   : > { %1678 = vpow2.f32 %v1225_v49 }
 0x2c9   : > { %v1132_v0 = vpop.xlane.xlu1 %1131 }
 0x2ca   : > { %v2961_v52 = vsub.f32 %v2833_v14, %v1132_v0 }
 0x2cc   : > { %v1677_v33 = vpop.eup %1676  ;;  %v1227_v53 = vmul.f32 1.442695, %v2961_v52 }
 0x2cd   : > { %v1679_v20 = vpop.eup %1678  ;;  %1287 = vadd.xlane.f32.xlu1 %v1677_v33 }
 0x2ce   : > { %1680 = vpow2.f32 %v1227_v53  ;;  %1289 = vadd.xlane.f32.xlu2 %v1679_v20 }
 0x2d1   : > { %v1134_v2 = vpop.xlane.xlu2 %1133 }
 0x2d2   : > { %v2965_v5 = vsub.f32 %v2837_v9, %v1134_v2 }
 0x2d4   : > { %v1681_v63 = vpop.eup %1680  ;;  %v1229_v60 = vmul.f32 1.442695, %v2965_v5 }
 0x2d5   : > { %1291 = vadd.xlane.f32.xlu0 %v1681_v63 }
 0x2d6   : > { %1682 = vpow2.f32 %v1229_v60 }
 0x2d9   : > { %v1140_v1 = vpop.xlane.xlu2 %1139  ;;  %v1136_v35 = vpop.xlane.xlu0 %1135 }
 0x2da   : > { %v2969_v14 = vsub.f32 %v2841_v8, %v1140_v1  ;;  %v2972_v51 = vsub.f32 %v2844_v28, %v1136_v35 }
 0x2dc   : > { %v1683_v30 = vpop.eup %1682  ;;  %v1235_v18 = vmul.f32 1.442695, %v2969_v14  ;;  %v1231_v10 = vmul.f32 1.442695, %v2972_v51 }
 0x2dd   : > { %1293 = vadd.xlane.f32.xlu1 %v1683_v30 }
 0x2de   : > { %1684 = vpow2.f32 %v1235_v18 }
 0x2df   : > { %1686 = vpow2.f32 %v1231_v10 }
 0x2e1   : > { %v1138_v9 = vpop.xlane.xlu1 %1137  ;;  %v1146_v19 = vpop.xlane.xlu2 %1145 }
 0x2e2   : > { %v2977_v32 = vsub.f32 %v2852_v34, %v1138_v9  ;;  %v2980_v16 = vsub.f32 %v2849_v36, %v1146_v19  ;;  %v1142_v8 = vpop.xlane.xlu0 %1141 }
 0x2e3   : > { %v2983_v28 = vsub.f32 %v2855_v17, %v1142_v8 }
 0x2e4   : > { %v1685_v50 = vpop.eup %1684  ;;  %v1233_v21 = vmul.f32 1.442695, %v2977_v32  ;;  %v1241_v54 = vmul.f32 1.442695, %v2980_v16 }
 0x2e5   : > { %v1687_v55 = vpop.eup %1686  ;;  %v1237_v11 = vmul.f32 1.442695, %v2983_v28  ;;  %1299 = vadd.xlane.f32.xlu1 %v1685_v50 }
 0x2e6   : > { %1688 = vpow2.f32 %v1233_v21  ;;  %1295 = vadd.xlane.f32.xlu2 %v1687_v55 }
 0x2e7   : > { %1690 = vpow2.f32 %v1241_v54 }
 0x2e8   : > { %1692 = vpow2.f32 %v1237_v11 }
 0x2e9   : > { %v1152_v34 = vpop.xlane.xlu2 %1151  ;;  %v1144_v36 = vpop.xlane.xlu1 %1143 }
 0x2ea   : > { %v2989_v43 = vsub.f32 %v2864_v23, %v1152_v34  ;;  %v2992_v17 = vsub.f32 %v2861_v38, %v1144_v36  ;;  %v1148_v22 = vpop.xlane.xlu0 %1147 }
 0x2eb   : > { %v2995_v42 = vsub.f32 %v2867_v29, %v1148_v22 }
 0x2ec   : > { %v1689_v46 = vpop.eup %1688  ;;  %v1247_v6 = vmul.f32 1.442695, %v2989_v43  ;;  %v1239_v59 = vmul.f32 1.442695, %v2992_v17 }
 0x2ed   : > { %v1691_v25 = vpop.eup %1690  ;;  %v1243_v49 = vmul.f32 1.442695, %v2995_v42  ;;  %1297 = vadd.xlane.f32.xlu0 %v1689_v46 }
 0x2ee   : > { %v1693_v7 = vpop.eup %1692  ;;  %1694 = vpow2.f32 %v1247_v6  ;;  %1305 = vadd.xlane.f32.xlu1 %v1691_v25 }
 0x2ef   : > { %1696 = vpow2.f32 %v1239_v59  ;;  %1301 = vadd.xlane.f32.xlu2 %v1693_v7 }
 0x2f0   : > { %1698 = vpow2.f32 %v1243_v49 }
 0x2f1   : > { %v1158_v38 = vpop.xlane.xlu2 %1157  ;;  %v1150_v23 = vpop.xlane.xlu1 %1149 }
 0x2f2   : > { %v3001_v29 = vsub.f32 %v2873_v45, %v1158_v38  ;;  %v3004_v0 = vsub.f32 %v2876_v61, %v1150_v23  ;;  %v1154_v33 = vpop.xlane.xlu0 %1153 }
 0x2f3   : > { %v3007_v53 = vsub.f32 %v2879_v3, %v1154_v33 }
 0x2f4   : > { %v1695_v20 = vpop.eup %1694  ;;  %v1253_v2 = vmul.f32 1.442695, %v3001_v29  ;;  %v1245_v63 = vmul.f32 1.442695, %v3004_v0 }
 0x2f5   : > { %v1697_v60 = vpop.eup %1696  ;;  %v1249_v1 = vmul.f32 1.442695, %v3007_v53 }
 0x2f6   : > { %v1699_v35 = vpop.eup %1698  ;;  %1700 = vpow2.f32 %v1253_v2  ;;  %1303 = vadd.xlane.f32.xlu0 %v1697_v60  ;;  %1311 = vadd.xlane.f32.xlu1 %v1695_v20 }
 0x2f7   : > { %1702 = vpow2.f32 %v1245_v63  ;;  %1307 = vadd.xlane.f32.xlu2 %v1699_v35 }
 0x2f8   : > { %1704 = vpow2.f32 %v1249_v1 }
 0x2f9   : > { %v1156_v45 = vpop.xlane.xlu1 %1155  ;;  %v1164_v61 = vpop.xlane.xlu2 %1163 }
 0x2fa   : > { %v3013_v3 = vsub.f32 %v2885_v27, %v1156_v45  ;;  %v3016_v30 = vsub.f32 %v2888_v56, %v1164_v61  ;;  %v1160_v18 = vpop.xlane.xlu0 %1159 }
 0x2fb   : > { %v3019_v10 = vsub.f32 %v2891_v4, %v1160_v18 }
 0x2fc   : > { %v1701_v9 = vpop.eup %1700  ;;  %v1251_v19 = vmul.f32 1.442695, %v3013_v3  ;;  %v1259_v8 = vmul.f32 1.442695, %v3016_v30 }
 0x2fd   : > { %v1703_v50 = vpop.eup %1702  ;;  %v1255_v21 = vmul.f32 1.442695, %v3019_v10 }
 0x2fe   : > { %v1705_v54 = vpop.eup %1704  ;;  %1706 = vpow2.f32 %v1251_v19  ;;  %1309 = vadd.xlane.f32.xlu0 %v1703_v50  ;;  %1317 = vadd.xlane.f32.xlu1 %v1701_v9 }
 0x2ff   : > { %1708 = vpow2.f32 %v1259_v8  ;;  %1313 = vadd.xlane.f32.xlu2 %v1705_v54 }
 0x300   : > { %1710 = vpow2.f32 %v1255_v21 }
 0x301   : > { %v1162_v27 = vpop.xlane.xlu1 %1161  ;;  %v1170_v56 = vpop.xlane.xlu2 %1169 }
 0x302   : > { %v3025_v4 = vsub.f32 %v2900_v39, %v1162_v27  ;;  %v3028_v55 = vsub.f32 %v2904_v31, %v1170_v56  ;;  %v1166_v11 = vpop.xlane.xlu0 %1165 }
 0x303   : > { %v3031_v34 = vsub.f32 %v2907_v24, %v1166_v11 }
 0x304   : > { %v1707_v36 = vpop.eup %1706  ;;  %v1257_v22 = vmul.f32 1.442695, %v3025_v4  ;;  %v1265_v46 = vmul.f32 1.442695, %v3028_v55 }
 0x305   : > { %v1709_v6 = vpop.eup %1708  ;;  %v1261_v59 = vmul.f32 1.442695, %v3031_v34 }
 0x306   : > { %v1711_v25 = vpop.eup %1710  ;;  %1712 = vpow2.f32 %v1257_v22  ;;  %1315 = vadd.xlane.f32.xlu0 %v1707_v36  ;;  %1323 = vadd.xlane.f32.xlu1 %v1709_v6 }
 0x307   : > { %1714 = vpow2.f32 %v1265_v46  ;;  %1319 = vadd.xlane.f32.xlu2 %v1711_v25 }
 0x308   : > { %1716 = vpow2.f32 %v1261_v59 }
 0x309   : > { %v1168_v39 = vpop.xlane.xlu1 %1167 }
 0x30a   : > { %v3037_v31 = vsub.f32 %v2920_v44, %v1168_v39  ;;  %v1268_v24 = vpop.xlane.xlu0 %1267 }
 0x30b   : > { %1718 = vlog2.f32 %v1268_v24 }
 0x30c   : > { %v1713_v49 = vpop.eup %1712  ;;  %v1263_v7 = vmul.f32 1.442695, %v3037_v31 }
 0x30d   : > { %v1715_v38 = vpop.eup %1714 }
 0x30e   : > { %v1717_v23 = vpop.eup %1716  ;;  %1720 = vpow2.f32 %v1263_v7  ;;  %1321 = vadd.xlane.f32.xlu0 %v1713_v49  ;;  %1329 = vadd.xlane.f32.xlu1 %v1715_v38 }
 0x30f   : > { %1325 = vadd.xlane.f32.xlu2 %v1717_v23 }
 0x310   : > { %v1272_v33 = vpop.xlane.xlu2 %1271 }
 0x311   : > { %v1719_v20 = vpop.eup %1718  ;;  %1722 = vlog2.f32 %v1272_v33  ;;  %v1270_v2 = vpop.xlane.xlu1 %1269 }
 0x312   : > { %v1332_v44 = vmul.f32 0.6931472, %v1719_v20  ;;  %1724 = vlog2.f32 %v1270_v2 }
 0x314   : > { %v1721_v63 = vpop.eup %1720  ;;  %v1395_v60 = vsub.f32 %v2897_v26, %v1332_v44 }
 0x316   : > { %1427 = vst [vmem:[%s3044_s29] sm:$0xff] %v1395_v60  ;;  %1327 = vadd.xlane.f32.xlu0 %v1721_v63 }
 0x317   : > { %v1723_v1 = vpop.eup %1722 }
 0x318   : > { %v1725_v35 = vpop.eup %1724  ;;  %v1336_v45 = vmul.f32 0.6931472, %v1723_v1  ;;  %v1274_v61 = vpop.xlane.xlu0 %1273 }
 0x319   : > { %v1334_v18 = vmul.f32 0.6931472, %v1725_v35  ;;  %1726 = vlog2.f32 %v1274_v61 }
 0x31a   : > { %v1397_v9 = vsub.f32 %v2916_v40, %v1336_v45 }
 0x31b   : > { %v1396_v19 = vsub.f32 %v2912_v62, %v1334_v18 }
 0x31c   : > { %1429 = vst [vmem:[%s3044_s29 + $0x10] sm:$0xff] %v1397_v9 }
 0x31d   : > { %1428 = vst [vmem:[%s3044_s29 + $0x8] sm:$0xff] %v1396_v19 }
 0x31f   : > { %v1727_v26 = vpop.eup %1726 }
 0x320   : > { %v1338_v8 = vmul.f32 0.6931472, %v1727_v26  ;;  %v1276_v50 = vpop.xlane.xlu1 %1275 }
 0x321   : > { %1728 = vlog2.f32 %v1276_v50 }
 0x322   : > { %v1398_v21 = vsub.f32 %v2925_v37, %v1338_v8 }
 0x324   : > { %1430 = vst [vmem:[%s3044_s29 + $0x18] sm:$0xff] %v1398_v21 }
 0x327   : > { %v1729_v54 = vpop.eup %1728 }
 0x328   : > { %v1340_v27 = vmul.f32 0.6931472, %v1729_v54  ;;  %v1278_v56 = vpop.xlane.xlu2 %1277 }
 0x329   : > { %1730 = vlog2.f32 %v1278_v56 }
 0x32a   : > { %v1399_v11 = vsub.f32 %v2929_v57, %v1340_v27 }
 0x32c   : > { %1431 = vst [vmem:[%s3044_s29 + $0x20] sm:$0xff] %v1399_v11 }
 0x32f   : > { %v1731_v40 = vpop.eup %1730 }
 0x330   : > { %v1342_v36 = vmul.f32 0.6931472, %v1731_v40  ;;  %v1280_v62 = vpop.xlane.xlu0 %1279 }
 0x331   : > { %v1284_v22 = vpop.xlane.xlu2 %1283  ;;  %1732 = vlog2.f32 %v1280_v62 }
 0x332   : > { %v1400_v46 = vsub.f32 %v2933_v13, %v1342_v36  ;;  %1734 = vlog2.f32 %v1284_v22 }
 0x334   : > { %1432 = vst [vmem:[%s3044_s29 + $0x28] sm:$0xff] %v1400_v46 }
 0x337   : > { %v1733_v37 = vpop.eup %1732 }
 0x338   : > { %v1735_v6 = vpop.eup %1734  ;;  %v1344_v59 = vmul.f32 0.6931472, %v1733_v37  ;;  %v1282_v25 = vpop.xlane.xlu1 %1281 }
 0x339   : > { %v1348_v39 = vmul.f32 0.6931472, %v1735_v6  ;;  %1736 = vlog2.f32 %v1282_v25  ;;  %v1286_v24 = vpop.xlane.xlu0 %1285 }
 0x33a   : > { %v1401_v57 = vsub.f32 %v2937_v12, %v1344_v59  ;;  %1738 = vlog2.f32 %v1286_v24 }
 0x33b   : > { %v1403_v49 = vsub.f32 %v2940_v41, %v1348_v39 }
 0x33c   : > { %1433 = vst [vmem:[%s3044_s29 + $0x30] sm:$0xff] %v1401_v57 }
 0x33d   : > { %1435 = vst [vmem:[%s3044_s29 + $0x40] sm:$0xff] %v1403_v49 }
 0x33f   : > { %v1737_v7 = vpop.eup %1736 }
 0x340   : > { %v1739_v13 = vpop.eup %1738  ;;  %v1346_v38 = vmul.f32 0.6931472, %v1737_v7  ;;  %v1288_v23 = vpop.xlane.xlu1 %1287 }
 0x341   : > { %v1350_v33 = vmul.f32 0.6931472, %v1739_v13  ;;  %1740 = vlog2.f32 %v1288_v23  ;;  %v1290_v20 = vpop.xlane.xlu2 %1289 }
 0x342   : > { %v1402_v2 = vsub.f32 %v2945_v48, %v1346_v38  ;;  %1742 = vlog2.f32 %v1290_v20 }
 0x343   : > { %v1404_v12 = vsub.f32 %v2948_v47, %v1350_v33 }
 0x344   : > { %1434 = vst [vmem:[%s3044_s29 + $0x38] sm:$0xff] %v1402_v2 }
 0x345   : > { %1436 = vst [vmem:[%s3044_s29 + $0x48] sm:$0xff] %v1404_v12 }
 0x347   : > { %v1741_v41 = vpop.eup %1740 }
 0x348   : > { %v1743_v44 = vpop.eup %1742  ;;  %v1352_v63 = vmul.f32 0.6931472, %v1741_v41  ;;  %v1292_v60 = vpop.xlane.xlu0 %1291 }
 0x349   : > { %v1354_v1 = vmul.f32 0.6931472, %v1743_v44  ;;  %1744 = vlog2.f32 %v1292_v60 }
 0x34a   : > { %v1405_v35 = vsub.f32 %v2953_v15, %v1352_v63 }
 0x34b   : > { %v1406_v45 = vsub.f32 %v2956_v58, %v1354_v1 }
 0x34c   : > { %1437 = vst [vmem:[%s3044_s29 + $0x50] sm:$0xff] %v1405_v35 }
 0x34d   : > { %1438 = vst [vmem:[%s3044_s29 + $0x58] sm:$0xff] %v1406_v45 }
 0x34f   : > { %v1745_v48 = vpop.eup %1744 }
 0x350   : > { %v1356_v61 = vmul.f32 0.6931472, %v1745_v48  ;;  %v1294_v18 = vpop.xlane.xlu1 %1293 }
 0x351   : > { %1746 = vlog2.f32 %v1294_v18 }
 0x352   : > { %v1407_v47 = vsub.f32 %v2961_v52, %v1356_v61 }
 0x354   : > { %1439 = vst [vmem:[%s3044_s29 + $0x60] sm:$0xff] %v1407_v47 }
 0x357   : > { %v1747_v9 = vpop.eup %1746 }
 0x358   : > { %v1358_v19 = vmul.f32 0.6931472, %v1747_v9  ;;  %v1300_v26 = vpop.xlane.xlu1 %1299 }
 0x359   : > { %1748 = vlog2.f32 %v1300_v26  ;;  %v1296_v8 = vpop.xlane.xlu2 %1295 }
 0x35a   : > { %v1408_v15 = vsub.f32 %v2965_v5, %v1358_v19  ;;  %1750 = vlog2.f32 %v1296_v8 }
 0x35c   : > { %1440 = vst [vmem:[%s3044_s29 + $0x68] sm:$0xff] %v1408_v15 }
 0x35f   : > { %v1749_v58 = vpop.eup %1748 }
 0x360   : > { %v1751_v50 = vpop.eup %1750  ;;  %v1364_v21 = vmul.f32 0.6931472, %v1749_v58  ;;  %v1298_v54 = vpop.xlane.xlu0 %1297 }
 0x361   : > { %v1360_v27 = vmul.f32 0.6931472, %v1751_v50  ;;  %v1306_v56 = vpop.xlane.xlu1 %1305  ;;  %1752 = vlog2.f32 %v1298_v54 }
 0x362   : > { %v1411_v52 = vsub.f32 %v2969_v14, %v1364_v21  ;;  %1754 = vlog2.f32 %v1306_v56  ;;  %v1302_v11 = vpop.xlane.xlu2 %1301 }
 0x363   : > { %v1409_v40 = vsub.f32 %v2972_v51, %v1360_v27  ;;  %1756 = vlog2.f32 %v1302_v11 }
 0x364   : > { %1443 = vst [vmem:[%s3044_s29 + $0x80] sm:$0xff] %v1411_v52 }
 0x365   : > { %1441 = vst [vmem:[%s3044_s29 + $0x70] sm:$0xff] %v1409_v40 }
 0x367   : > { %v1753_v5 = vpop.eup %1752 }
 0x368   : > { %v1755_v36 = vpop.eup %1754  ;;  %v1362_v62 = vmul.f32 0.6931472, %v1753_v5 }
 0x369   : > { %v1757_v22 = vpop.eup %1756  ;;  %v1370_v46 = vmul.f32 0.6931472, %v1755_v36  ;;  %v1312_v37 = vpop.xlane.xlu1 %1311 }
 0x36a   : > { %v1304_v6 = vpop.xlane.xlu0 %1303  ;;  %v1366_v59 = vmul.f32 0.6931472, %v1757_v22  ;;  %v1410_v14 = vsub.f32 %v2977_v32, %v1362_v62  ;;  %1758 = vlog2.f32 %v1312_v37  ;;  %v1308_v25 = vpop.xlane.xlu2 %1307 }
 0x36b   : > { %v1414_v51 = vsub.f32 %v2980_v16, %v1370_v46  ;;  %1760 = vlog2.f32 %v1308_v25 }
 0x36c   : > { %v1412_v39 = vsub.f32 %v2983_v28, %v1366_v59  ;;  %1442 = vst [vmem:[%s3044_s29 + $0x78] sm:$0xff] %v1410_v14  ;;  %1762 = vlog2.f32 %v1304_v6 }
 0x36d   : > { %1446 = vst [vmem:[%s3044_s29 + $0x98] sm:$0xff] %v1414_v51 }
 0x36e   : > { %1444 = vst [vmem:[%s3044_s29 + $0x88] sm:$0xff] %v1412_v39 }
 0x370   : > { %v1759_v24 = vpop.eup %1758 }
 0x371   : > { %v1761_v57 = vpop.eup %1760  ;;  %v1376_v49 = vmul.f32 0.6931472, %v1759_v24  ;;  %v1318_v7 = vpop.xlane.xlu1 %1317 }
 0x372   : > { %v1310_v13 = vpop.xlane.xlu0 %1309  ;;  %v1763_v32 = vpop.eup %1762  ;;  %v1372_v38 = vmul.f32 0.6931472, %v1761_v57  ;;  %1764 = vlog2.f32 %v1318_v7 }
 0x373   : > { %v1314_v23 = vpop.xlane.xlu2 %1313  ;;  %v1417_v16 = vsub.f32 %v2989_v43, %v1376_v49  ;;  %v1368_v33 = vmul.f32 0.6931472, %v1763_v32 }
 0x374   : > { %1766 = vlog2.f32 %v1314_v23  ;;  %v1415_v28 = vsub.f32 %v2995_v42, %v1372_v38 }
 0x375   : > { %1768 = vlog2.f32 %v1310_v13  ;;  %1449 = vst [vmem:[%s3044_s29 + $0xb0] sm:$0xff] %v1417_v16  ;;  %v1413_v20 = vsub.f32 %v2992_v17, %v1368_v33 }
 0x376   : > { %1447 = vst [vmem:[%s3044_s29 + $0xa0] sm:$0xff] %v1415_v28 }
 0x377   : > { %1445 = vst [vmem:[%s3044_s29 + $0x90] sm:$0xff] %v1413_v20 }
 0x378   : > { %v1765_v2 = vpop.eup %1764 }
 0x379   : > { %v1382_v41 = vmul.f32 0.6931472, %v1765_v2  ;;  %v1324_v44 = vpop.xlane.xlu1 %1323 }
 0x37a   : > { %v1767_v12 = vpop.eup %1766  ;;  %v1316_v63 = vpop.xlane.xlu0 %1315  ;;  %1770 = vlog2.f32 %v1324_v44 }
 0x37b   : > { %v1769_v60 = vpop.eup %1768  ;;  %v1378_v43 = vmul.f32 0.6931472, %v1767_v12  ;;  %v1320_v1 = vpop.xlane.xlu2 %1319  ;;  %v1420_v42 = vsub.f32 %v3001_v29, %v1382_v41 }
 0x37c   : > { %v1374_v35 = vmul.f32 0.6931472, %v1769_v60  ;;  %1772 = vlog2.f32 %v1320_v1 }
 0x37d   : > { %v1418_v17 = vsub.f32 %v3007_v53, %v1378_v43  ;;  %1774 = vlog2.f32 %v1316_v63  ;;  %1452 = vst [vmem:[%s3044_s29 + $0xc8] sm:$0xff] %v1420_v42 }
 0x37e   : > { %v1416_v45 = vsub.f32 %v3004_v0, %v1374_v35 }
 0x37f   : > { %1450 = vst [vmem:[%s3044_s29 + $0xb8] sm:$0xff] %v1418_v17 }
 0x380   : > { %1448 = vst [vmem:[%s3044_s29 + $0xa8] sm:$0xff] %v1416_v45  ;;  %v1771_v48 = vpop.eup %1770 }
 0x381   : > { %v1388_v18 = vmul.f32 0.6931472, %v1771_v48  ;;  %v1330_v47 = vpop.xlane.xlu1 %1329 }
 0x382   : > { %v1773_v61 = vpop.eup %1772  ;;  %v1322_v9 = vpop.xlane.xlu0 %1321  ;;  %1776 = vlog2.f32 %v1330_v47 }
 0x383   : > { %v1775_v19 = vpop.eup %1774  ;;  %v1384_v29 = vmul.f32 0.6931472, %v1773_v61  ;;  %v1326_v26 = vpop.xlane.xlu2 %1325  ;;  %v1423_v53 = vsub.f32 %v3016_v30, %v1388_v18 }
 0x384   : > { %v1380_v8 = vmul.f32 0.6931472, %v1775_v19  ;;  %1778 = vlog2.f32 %v1326_v26 }
 0x385   : > { %v1421_v0 = vsub.f32 %v3019_v10, %v1384_v29  ;;  %1780 = vlog2.f32 %v1322_v9  ;;  %1455 = vst [vmem:[%s3044_s29 + $0xe0] sm:$0xff] %v1423_v53 }
 0x386   : > { %v1419_v15 = vsub.f32 %v3013_v3, %v1380_v8 }
 0x387   : > { %1453 = vst [vmem:[%s3044_s29 + $0xd0] sm:$0xff] %v1421_v0 }
 0x388   : > { %1451 = vst [vmem:[%s3044_s29 + $0xc0] sm:$0xff] %v1419_v15  ;;  %v1777_v58 = vpop.eup %1776 }
 0x389   : > { %v1394_v21 = vmul.f32 0.6931472, %v1777_v58 }
 0x38a   : > { %v1779_v50 = vpop.eup %1778  ;;  %v1328_v54 = vpop.xlane.xlu0 %1327 }
 0x38b   : > { %v1781_v30 = vpop.eup %1780  ;;  %v1390_v27 = vmul.f32 0.6931472, %v1779_v50  ;;  %1782 = vlog2.f32 %v1328_v54  ;;  %v1426_v10 = vsub.f32 %v3028_v55, %v1394_v21 }
 0x38c   : > { %v1386_v56 = vmul.f32 0.6931472, %v1781_v30 }
 0x38d   : > { %v1424_v3 = vsub.f32 %v3031_v34, %v1390_v27  ;;  %1458 = vst [vmem:[%s3044_s29 + $0xf8] sm:$0xff] %v1426_v10 }
 0x38e   : > { %v1422_v52 = vsub.f32 %v3025_v4, %v1386_v56 }
 0x38f   : > { %1456 = vst [vmem:[%s3044_s29 + $0xe8] sm:$0xff] %v1424_v3 }
 0x390   : > { %1454 = vst [vmem:[%s3044_s29 + $0xd8] sm:$0xff] %v1422_v52 }
 0x391   : > { %v1783_v11 = vpop.eup %1782 }
 0x392   : > { %v1392_v40 = vmul.f32 0.6931472, %v1783_v11 }
 0x394   : > { %v1425_v55 = vsub.f32 %v3037_v31, %v1392_v40 }
 0x396   : > { %1457 = vst [vmem:[%s3044_s29 + $0xf0] sm:$0xff] %v1425_v55 }
 0x397   : > { %1811 = shalt.err (!%p1808_p3)
}
 0x398   : > { %s1852_s25 = smov 128   ;;  %s1853_s26 = smov 8  }
 0x399   : > { %1598 = dma.vmem_to_hbm [thread:$0]  (%p1912_p5), %s1473_s16, 4096, %s1475_s7, %s1460_s8, %s1852_s25, %s1852_s25, %s1853_s26  }
 0x39a PF: > { %p1604_p4 = scmp.ge.s32.totalorder %s1846_s15, 2  ;;  %s1489_s27 = sand.u32 1, %s1834_s12  }
 0x39b   : > { %s1490_s28 = scalar_lea.sflag [#allocation3], %s1489_s27 }
 0x39c   : > { %p1601_p7 = pnand %p1604_p4, %p1916_p6 }
 0x39e   : > { %p1602_p8 = pneg %p1601_p7 }
 0x3a0   : > { %1829 = dma.done.wait (%p1602_p8), %s1490_s28, 4096  }
 0x3a1   : > { %1831 = vsyncadd (%p1602_p8), %s1490_s28, 4294963200  ;;  %p13_p9 = scmp.ge.s32.totalorder %s1899_s18, 4   ;;  %s3224_s12 = smov %s1838_s13 }
 0x3a2   : > { %s3225_s13 = smov %s1842_s14  ;;  %s3226_s14 = smov %s1910_s21 }
 0x3a3   : > { %s3227_s15 = smov %s1899_s18  ;;  %15 = sbr.rel (!%p13_p9) target bundleno = 3 (0x3), region = 67 }
 0x3a8   :  { %1496 = vsyncpa [#allocation3], 1 }
 0x3a9   :  { %1498 = vsyncpa [#allocation3 + $0x1], 1 }

</bundles_post_ra>
